<compile_context>
chip_gen: v5e
topology: v5e:2x2
jax: 0.10.0
libtpu: 0.0.40
codegen_flags: <defaults>
</compile_context>

<pallas_src>
import functools

import jax
import jax.numpy as jnp
from jax.experimental import pallas as pl
from jax.experimental.pallas import tpu as pltpu


def _channel_chunk_sum_max(x_ref, c_sub=8):
    """Streaming channel reduction over the (Bblk, Cblk, HW) input block.

    Sum accumulates in f32; max stays in the native dtype (exact), so no full
    f32 upcast copy of the block is ever materialized.
    """
    cblk = x_ref.shape[1]
    part_sum = None
    part_max = None
    for c0 in range(0, cblk, c_sub):
        c1 = min(cblk, c0 + c_sub)
        xc = x_ref[:, c0:c1, :]                             # (Bblk, <=c_sub, HW)
        s = jnp.sum(xc.astype(jnp.float32), axis=1)         # f32 accumulation
        m = jnp.max(xc, axis=1)                             # exact in native dtype
        part_sum = s if part_sum is None else part_sum + s
        part_max = m if part_max is None else jnp.maximum(part_max, m)
    return part_sum, part_max


def _conv_2ch_to_1(avg, mx, w_ref, *, H, W, K, P):
    """KxK 'same' conv of the two (Bblk, H*W) f32 planes, weights from SMEM.

    Factored as K column rolls (shared by both channels) -> K*K scalar MACs
    into K per-row accumulators -> K row rolls.  pltpu.roll runs on the XLU;
    masks remove the cyclic wrap-around, so no padded scratch or extra stores.
    """
    Bblk, HW = avg.shape

    # Boundary masks from iota; only one compare per tap (hoisted, shared).
    pos = jax.lax.broadcasted_iota(jnp.int32, (Bblk, HW), 1)
    if (W & (W - 1)) == 0:                                  # power-of-two fast path
        w_idx = jnp.bitwise_and(pos, W - 1)
        h_idx = jnp.right_shift(pos, W.bit_length() - 1)
    else:
        w_idx = pos % W
        h_idx = pos // W

    # Hoisted scalar weight reads from SMEM (layout [c, kh, kw]; c0=avg, c1=max).
    wv = [[[w_ref[c * K * K + kh * K + kw] for kw in range(K)]
           for kh in range(K)] for c in range(2)]

    # kw outermost: only K accumulators + 2 shifted planes stay live
    # (vs 2K shifted planes when kh is outermost) -> no vreg spills.
    acc = [jnp.zeros((Bblk, HW), jnp.float32) for _ in range(K)]
    for kw in range(K):
        dw = kw - P
        if dw == 0:
            sa, sm = avg, mx
        else:
            ok_w = (w_idx < (W - dw)) if dw > 0 else (w_idx >= (-dw))
            sa = jnp.where(ok_w, pltpu.roll(avg, (-dw) % HW, 1), 0.0)
            sm = jnp.where(ok_w, pltpu.roll(mx, (-dw) % HW, 1), 0.0)
        for kh in range(K):
            acc[kh] = acc[kh] + wv[0][kh][kw] * sa + wv[1][kh][kw] * sm

    # One row roll (+mask) per kh; two independent output accumulators (ILP).
    out0 = jnp.zeros((Bblk, HW), jnp.float32)
    out1 = jnp.zeros((Bblk, HW), jnp.float32)
    for kh in range(K):
        dh = kh - P
        if dh == 0:
            contrib = acc[kh]
        else:
            ok_h = (h_idx < (H - dh)) if dh > 0 else (h_idx >= (-dh))
            contrib = jnp.where(ok_h, pltpu.roll(acc[kh], (-dh * W) % HW, 1), 0.0)
        if kh & 1:
            out1 = out1 + contrib
        else:
            out0 = out0 + contrib
    return out0 + out1


def _spatial_attention_kernel(w_ref, x_ref, o_ref, sum_scr, max_scr, *,
                              H, W, K, P, C_total, n_c_steps):
    part_sum, part_max = _channel_chunk_sum_max(x_ref)
    inv_c = jnp.float32(1.0 / C_total)

    if n_c_steps == 1:
        # Whole channel dim in one step: no scratch round trip needed.
        y = _conv_2ch_to_1(part_sum * inv_c, part_max.astype(jnp.float32),
                           w_ref, H=H, W=W, K=K, P=P)
        o_ref[...] = y.astype(o_ref.dtype)
    else:
        c_idx = pl.program_id(1)

        @pl.when(c_idx == 0)
        def _():
            sum_scr[...] = part_sum
            max_scr[...] = part_max

        @pl.when(c_idx != 0)
        def _():
            sum_scr[...] = sum_scr[...] + part_sum
            max_scr[...] = jnp.maximum(max_scr[...], part_max)

        @pl.when(c_idx == n_c_steps - 1)
        def _():
            y = _conv_2ch_to_1(sum_scr[...] * inv_c,
                               max_scr[...].astype(jnp.float32),
                               w_ref, H=H, W=W, K=K, P=P)
            o_ref[...] = y.astype(o_ref.dtype)


def _divisor_candidates(n, align=8):
    """Divisors of n that are multiples of `align`, plus n itself (8,128)-legal."""
    cands = {n}
    for d in range(align, n, align):
        if n % d == 0:
            cands.add(d)
    return sorted(cands)


def _choose_blocks(N, C, HW, itemsize):
    MAX_BHW = 2048          # ~11-13 live f32 (Bblk,HW) planes ~ the vreg file
    IN_BUDGET = 2 << 20     # per-step input block (x2 when double-buffered)

    # Bblk: divisor of N, multiple of 8 (or == N), so the dense (Bblk, HW)
    # output block obeys the (8, 128) tiling rule.
    b_cands = _divisor_candidates(N)
    fit = [b for b in b_cands if b * HW <= MAX_BHW]
    bblk = max(fit) if fit else min(b_cands)
    if N // bblk < 2:        # keep >=2 N-steps when possible (v7x megacore)
        alt = [b for b in b_cands if N // b >= 2]
        if alt:
            alt_fit = [b for b in alt if b * HW <= MAX_BHW]
            bblk = max(alt_fit) if alt_fit else max(alt)

    # Cblk: divisor of C, multiple of 8 (or == C), sized to the DMA budget.
    c_cands = _divisor_candidates(C)
    per_c = max(1, bblk * HW * itemsize)
    fit_c = [c for c in c_cands if c * per_c <= IN_BUDGET]
    cblk = max(fit_c) if fit_c else min(c_cands)
    return bblk, cblk


def spatial_attention(x, weight, kernel_size=7):
    """x: (N, C, H, W); weight: (1, 2, K, K) from nn.Conv2d(2, 1, K, padding=P, bias=False).

    Returns conv2d(concat([mean_c(x), max_c(x)], 1), weight) of shape (N, 1, H, W).
    """
    assert kernel_size in (3, 7), "kernel size must be 3 or 7"
    N, C, H, W = x.shape
    K = kernel_size
    P = 3 if K == 7 else 1
    HW = H * W

    x_flat = x.reshape(N, C, HW)                       # contiguous, free reshape
    w_flat = weight.reshape(-1).astype(jnp.float32)    # (2*K*K,), layout [c, kh, kw]

    itemsize = x.dtype.itemsize
    Bblk, Cblk = _choose_blocks(N, C, HW, itemsize)
    n_c_steps = C // Cblk
    grid = (N // Bblk, n_c_steps)

    # VMEM budget: double-buffered in/out blocks + scratch + ~16 live f32
    # intermediate planes, with margin; clamped to a v7x-safe scoped limit.
    working = (2 * Bblk * Cblk * HW * itemsize
               + 2 * Bblk * HW * itemsize
               + Bblk * HW * (4 + itemsize)
               + 16 * Bblk * HW * 4)
    vmem_limit = int(min(max(2 * working + (4 << 20), 16 << 20), 32 << 20))

    kernel = functools.partial(_spatial_attention_kernel,
                               H=H, W=W, K=K, P=P,
                               C_total=C, n_c_steps=n_c_steps)

    out_flat = pl.pallas_call(
        kernel,
        out_shape=jax.ShapeDtypeStruct((N, HW), x.dtype),
        grid_spec=pltpu.PrefetchScalarGridSpec(
            num_scalar_prefetch=0,
            grid=grid,
            in_specs=[
                # tiny conv weight: SMEM, cheap hoisted scalar reads
                pl.BlockSpec(memory_space=pltpu.MemorySpace.SMEM),
                # (Bblk images, Cblk channels) per step, spatial axis lane-dense
                pl.BlockSpec((Bblk, Cblk, HW), lambda n, c: (n, c, 0)),
            ],
            # Same output block across the C (reduction) axis; written on last c.
            out_specs=pl.BlockSpec((Bblk, HW), lambda n, c: (n, 0)),
            scratch_shapes=[
                pltpu.VMEM((Bblk, HW), jnp.float32),   # running channel sum
                pltpu.VMEM((Bblk, HW), x.dtype),       # running channel max
            ],
        ),
        compiler_params=pltpu.CompilerParams(
            dimension_semantics=("parallel", "arbitrary"),
            vmem_limit_bytes=vmem_limit),
    )(w_flat, x_flat)

    return out_flat.reshape(N, 1, H, W)


def _reference(x, weight, kernel_size=7):
    P = 3 if kernel_size == 7 else 1
    avg = jnp.mean(x, axis=1, keepdims=True)
    mx = jnp.max(x, axis=1, keepdims=True)
    xc = jnp.concatenate([avg, mx], axis=1)
    return jax.lax.conv_general_dilated(
        xc, weight, window_strides=(1, 1), padding=((P, P), (P, P)),
        dimension_numbers=("NCHW", "OIHW", "NCHW"))


if __name__ == "__main__":
    key = jax.random.PRNGKey(0)
    kx, kw = jax.random.split(key)

    N, C, H, W = 2, 4, 16, 16
    K = 7
    x = jax.random.normal(kx, (N, C, H, W), dtype=jnp.float32)
    # Deterministic synthetic conv1 weight, shape (out=1, in=2, K, K) as in
    # nn.Conv2d(2, 1, 7, padding=3, bias=False).
    weight = jax.random.normal(kw, (1, 2, K, K), dtype=jnp.float32) * 0.1

    out = spatial_attention(x, weight, kernel_size=K)
    out = jax.block_until_ready(out)

    ref = _reference(x, weight, kernel_size=K)
    assert out.shape == (N, 1, H, W)
    err = float(jnp.max(jnp.abs(out - ref)))
    assert jnp.allclose(out, ref, rtol=1e-4, atol=1e-4), f"max abs err = {err}"

    print("KERNEL_OK")
</pallas_src>

<mosaic_0001>
module attributes {stable_mosaic.version = 11 : i64} {
  func.func @_spatial_attention_kernel(%arg0: i32, %arg1: i32, %arg2: memref<98xf32, #tpu.memory_space<smem>>, %arg3: memref<2x4x256xf32, #tpu.memory_space<vmem>>, %arg4: memref<2x256xf32, #tpu.memory_space<vmem>>, %arg5: memref<2x256xf32, #tpu.memory_space<vmem>>, %arg6: memref<2x256xf32, #tpu.memory_space<vmem>>) attributes {dimension_semantics = [#tpu.dimension_semantics<parallel>, #tpu.dimension_semantics<arbitrary>], iteration_bounds = array<i64: 1, 1>, scalar_prefetch = 0 : i64, scratch_operands = 2 : i64, tpu.core_type = #tpu.core_type<tc>, window_params = [{transform_indices = @transform_0, window_bounds = array<i64: 98>}, {transform_indices = @transform_1, window_bounds = array<i64: 2, 4, 256>}, {transform_indices = @transform_2, window_bounds = array<i64: 2, 256>}]} {
    %c0 = arith.constant 0 : index
    %c0_0 = arith.constant 0 : index
    %c0_1 = arith.constant 0 : index
    %0 = vector.load %arg3[%c0, %c0_0, %c0_1] : memref<2x4x256xf32, #tpu.memory_space<vmem>>, vector<2x4x256xf32>
    %cst = arith.constant dense<0.000000e+00> : vector<2x256xf32>
    %1 = vector.multi_reduction <add>, %0, %cst [1] : vector<2x4x256xf32> to vector<2x256xf32>
    %cst_2 = arith.constant dense<0xFF800000> : vector<2x256xf32>
    %2 = vector.multi_reduction <maximumf>, %0, %cst_2 [1] : vector<2x4x256xf32> to vector<2x256xf32>
    %cst_3 = arith.constant 2.500000e-01 : f32
    %3 = vector.broadcast %cst_3 : f32 to vector<2x256xf32>
    %4 = arith.mulf %1, %3 : vector<2x256xf32>
    %5 = tpu.iota {dimensions = array<i32: 1>} : vector<2x256xi32>
    %c15_i32 = arith.constant 15 : i32
    %6 = vector.broadcast %c15_i32 : i32 to vector<2x256xi32>
    %7 = arith.andi %5, %6 : vector<2x256xi32>
    %c4_i32 = arith.constant 4 : i32
    %8 = vector.broadcast %c4_i32 : i32 to vector<2x256xi32>
    %9 = arith.shrsi %5, %8 : vector<2x256xi32>
    %c0_4 = arith.constant 0 : index
    %10 = memref.load %arg2[%c0_4] : memref<98xf32, #tpu.memory_space<smem>>
    %c1 = arith.constant 1 : index
    %11 = memref.load %arg2[%c1] : memref<98xf32, #tpu.memory_space<smem>>
    %c2 = arith.constant 2 : index
    %12 = memref.load %arg2[%c2] : memref<98xf32, #tpu.memory_space<smem>>
    %c3 = arith.constant 3 : index
    %13 = memref.load %arg2[%c3] : memref<98xf32, #tpu.memory_space<smem>>
    %c4 = arith.constant 4 : index
    %14 = memref.load %arg2[%c4] : memref<98xf32, #tpu.memory_space<smem>>
    %c5 = arith.constant 5 : index
    %15 = memref.load %arg2[%c5] : memref<98xf32, #tpu.memory_space<smem>>
    %c6 = arith.constant 6 : index
    %16 = memref.load %arg2[%c6] : memref<98xf32, #tpu.memory_space<smem>>
    %c7 = arith.constant 7 : index
    %17 = memref.load %arg2[%c7] : memref<98xf32, #tpu.memory_space<smem>>
    %c8 = arith.constant 8 : index
    %18 = memref.load %arg2[%c8] : memref<98xf32, #tpu.memory_space<smem>>
    %c9 = arith.constant 9 : index
    %19 = memref.load %arg2[%c9] : memref<98xf32, #tpu.memory_space<smem>>
    %c10 = arith.constant 10 : index
    %20 = memref.load %arg2[%c10] : memref<98xf32, #tpu.memory_space<smem>>
    %c11 = arith.constant 11 : index
    %21 = memref.load %arg2[%c11] : memref<98xf32, #tpu.memory_space<smem>>
    %c12 = arith.constant 12 : index
    %22 = memref.load %arg2[%c12] : memref<98xf32, #tpu.memory_space<smem>>
    %c13 = arith.constant 13 : index
    %23 = memref.load %arg2[%c13] : memref<98xf32, #tpu.memory_space<smem>>
    %c14 = arith.constant 14 : index
    %24 = memref.load %arg2[%c14] : memref<98xf32, #tpu.memory_space<smem>>
    %c15 = arith.constant 15 : index
    %25 = memref.load %arg2[%c15] : memref<98xf32, #tpu.memory_space<smem>>
    %c16 = arith.constant 16 : index
    %26 = memref.load %arg2[%c16] : memref<98xf32, #tpu.memory_space<smem>>
    %c17 = arith.constant 17 : index
    %27 = memref.load %arg2[%c17] : memref<98xf32, #tpu.memory_space<smem>>
    %c18 = arith.constant 18 : index
    %28 = memref.load %arg2[%c18] : memref<98xf32, #tpu.memory_space<smem>>
    %c19 = arith.constant 19 : index
    %29 = memref.load %arg2[%c19] : memref<98xf32, #tpu.memory_space<smem>>
    %c20 = arith.constant 20 : index
    %30 = memref.load %arg2[%c20] : memref<98xf32, #tpu.memory_space<smem>>
    %c21 = arith.constant 21 : index
    %31 = memref.load %arg2[%c21] : memref<98xf32, #tpu.memory_space<smem>>
    %c22 = arith.constant 22 : index
    %32 = memref.load %arg2[%c22] : memref<98xf32, #tpu.memory_space<smem>>
    %c23 = arith.constant 23 : index
    %33 = memref.load %arg2[%c23] : memref<98xf32, #tpu.memory_space<smem>>
    %c24 = arith.constant 24 : index
    %34 = memref.load %arg2[%c24] : memref<98xf32, #tpu.memory_space<smem>>
    %c25 = arith.constant 25 : index
    %35 = memref.load %arg2[%c25] : memref<98xf32, #tpu.memory_space<smem>>
    %c26 = arith.constant 26 : index
    %36 = memref.load %arg2[%c26] : memref<98xf32, #tpu.memory_space<smem>>
    %c27 = arith.constant 27 : index
    %37 = memref.load %arg2[%c27] : memref<98xf32, #tpu.memory_space<smem>>
    %c28 = arith.constant 28 : index
    %38 = memref.load %arg2[%c28] : memref<98xf32, #tpu.memory_space<smem>>
    %c29 = arith.constant 29 : index
    %39 = memref.load %arg2[%c29] : memref<98xf32, #tpu.memory_space<smem>>
    %c30 = arith.constant 30 : index
    %40 = memref.load %arg2[%c30] : memref<98xf32, #tpu.memory_space<smem>>
    %c31 = arith.constant 31 : index
    %41 = memref.load %arg2[%c31] : memref<98xf32, #tpu.memory_space<smem>>
    %c32 = arith.constant 32 : index
    %42 = memref.load %arg2[%c32] : memref<98xf32, #tpu.memory_space<smem>>
    %c33 = arith.constant 33 : index
    %43 = memref.load %arg2[%c33] : memref<98xf32, #tpu.memory_space<smem>>
    %c34 = arith.constant 34 : index
    %44 = memref.load %arg2[%c34] : memref<98xf32, #tpu.memory_space<smem>>
    %c35 = arith.constant 35 : index
    %45 = memref.load %arg2[%c35] : memref<98xf32, #tpu.memory_space<smem>>
    %c36 = arith.constant 36 : index
    %46 = memref.load %arg2[%c36] : memref<98xf32, #tpu.memory_space<smem>>
    %c37 = arith.constant 37 : index
    %47 = memref.load %arg2[%c37] : memref<98xf32, #tpu.memory_space<smem>>
    %c38 = arith.constant 38 : index
    %48 = memref.load %arg2[%c38] : memref<98xf32, #tpu.memory_space<smem>>
    %c39 = arith.constant 39 : index
    %49 = memref.load %arg2[%c39] : memref<98xf32, #tpu.memory_space<smem>>
    %c40 = arith.constant 40 : index
    %50 = memref.load %arg2[%c40] : memref<98xf32, #tpu.memory_space<smem>>
    %c41 = arith.constant 41 : index
    %51 = memref.load %arg2[%c41] : memref<98xf32, #tpu.memory_space<smem>>
    %c42 = arith.constant 42 : index
    %52 = memref.load %arg2[%c42] : memref<98xf32, #tpu.memory_space<smem>>
    %c43 = arith.constant 43 : index
    %53 = memref.load %arg2[%c43] : memref<98xf32, #tpu.memory_space<smem>>
    %c44 = arith.constant 44 : index
    %54 = memref.load %arg2[%c44] : memref<98xf32, #tpu.memory_space<smem>>
    %c45 = arith.constant 45 : index
    %55 = memref.load %arg2[%c45] : memref<98xf32, #tpu.memory_space<smem>>
    %c46 = arith.constant 46 : index
    %56 = memref.load %arg2[%c46] : memref<98xf32, #tpu.memory_space<smem>>
    %c47 = arith.constant 47 : index
    %57 = memref.load %arg2[%c47] : memref<98xf32, #tpu.memory_space<smem>>
    %c48 = arith.constant 48 : index
    %58 = memref.load %arg2[%c48] : memref<98xf32, #tpu.memory_space<smem>>
    %c49 = arith.constant 49 : index
    %59 = memref.load %arg2[%c49] : memref<98xf32, #tpu.memory_space<smem>>
    %c50 = arith.constant 50 : index
    %60 = memref.load %arg2[%c50] : memref<98xf32, #tpu.memory_space<smem>>
    %c51 = arith.constant 51 : index
    %61 = memref.load %arg2[%c51] : memref<98xf32, #tpu.memory_space<smem>>
    %c52 = arith.constant 52 : index
    %62 = memref.load %arg2[%c52] : memref<98xf32, #tpu.memory_space<smem>>
    %c53 = arith.constant 53 : index
    %63 = memref.load %arg2[%c53] : memref<98xf32, #tpu.memory_space<smem>>
    %c54 = arith.constant 54 : index
    %64 = memref.load %arg2[%c54] : memref<98xf32, #tpu.memory_space<smem>>
    %c55 = arith.constant 55 : index
    %65 = memref.load %arg2[%c55] : memref<98xf32, #tpu.memory_space<smem>>
    %c56 = arith.constant 56 : index
    %66 = memref.load %arg2[%c56] : memref<98xf32, #tpu.memory_space<smem>>
    %c57 = arith.constant 57 : index
    %67 = memref.load %arg2[%c57] : memref<98xf32, #tpu.memory_space<smem>>
    %c58 = arith.constant 58 : index
    %68 = memref.load %arg2[%c58] : memref<98xf32, #tpu.memory_space<smem>>
    %c59 = arith.constant 59 : index
    %69 = memref.load %arg2[%c59] : memref<98xf32, #tpu.memory_space<smem>>
    %c60 = arith.constant 60 : index
    %70 = memref.load %arg2[%c60] : memref<98xf32, #tpu.memory_space<smem>>
    %c61 = arith.constant 61 : index
    %71 = memref.load %arg2[%c61] : memref<98xf32, #tpu.memory_space<smem>>
    %c62 = arith.constant 62 : index
    %72 = memref.load %arg2[%c62] : memref<98xf32, #tpu.memory_space<smem>>
    %c63 = arith.constant 63 : index
    %73 = memref.load %arg2[%c63] : memref<98xf32, #tpu.memory_space<smem>>
    %c64 = arith.constant 64 : index
    %74 = memref.load %arg2[%c64] : memref<98xf32, #tpu.memory_space<smem>>
    %c65 = arith.constant 65 : index
    %75 = memref.load %arg2[%c65] : memref<98xf32, #tpu.memory_space<smem>>
    %c66 = arith.constant 66 : index
    %76 = memref.load %arg2[%c66] : memref<98xf32, #tpu.memory_space<smem>>
    %c67 = arith.constant 67 : index
    %77 = memref.load %arg2[%c67] : memref<98xf32, #tpu.memory_space<smem>>
    %c68 = arith.constant 68 : index
    %78 = memref.load %arg2[%c68] : memref<98xf32, #tpu.memory_space<smem>>
    %c69 = arith.constant 69 : index
    %79 = memref.load %arg2[%c69] : memref<98xf32, #tpu.memory_space<smem>>
    %c70 = arith.constant 70 : index
    %80 = memref.load %arg2[%c70] : memref<98xf32, #tpu.memory_space<smem>>
    %c71 = arith.constant 71 : index
    %81 = memref.load %arg2[%c71] : memref<98xf32, #tpu.memory_space<smem>>
    %c72 = arith.constant 72 : index
    %82 = memref.load %arg2[%c72] : memref<98xf32, #tpu.memory_space<smem>>
    %c73 = arith.constant 73 : index
    %83 = memref.load %arg2[%c73] : memref<98xf32, #tpu.memory_space<smem>>
    %c74 = arith.constant 74 : index
    %84 = memref.load %arg2[%c74] : memref<98xf32, #tpu.memory_space<smem>>
    %c75 = arith.constant 75 : index
    %85 = memref.load %arg2[%c75] : memref<98xf32, #tpu.memory_space<smem>>
    %c76 = arith.constant 76 : index
    %86 = memref.load %arg2[%c76] : memref<98xf32, #tpu.memory_space<smem>>
    %c77 = arith.constant 77 : index
    %87 = memref.load %arg2[%c77] : memref<98xf32, #tpu.memory_space<smem>>
    %c78 = arith.constant 78 : index
    %88 = memref.load %arg2[%c78] : memref<98xf32, #tpu.memory_space<smem>>
    %c79 = arith.constant 79 : index
    %89 = memref.load %arg2[%c79] : memref<98xf32, #tpu.memory_space<smem>>
    %c80 = arith.constant 80 : index
    %90 = memref.load %arg2[%c80] : memref<98xf32, #tpu.memory_space<smem>>
    %c81 = arith.constant 81 : index
    %91 = memref.load %arg2[%c81] : memref<98xf32, #tpu.memory_space<smem>>
    %c82 = arith.constant 82 : index
    %92 = memref.load %arg2[%c82] : memref<98xf32, #tpu.memory_space<smem>>
    %c83 = arith.constant 83 : index
    %93 = memref.load %arg2[%c83] : memref<98xf32, #tpu.memory_space<smem>>
    %c84 = arith.constant 84 : index
    %94 = memref.load %arg2[%c84] : memref<98xf32, #tpu.memory_space<smem>>
    %c85 = arith.constant 85 : index
    %95 = memref.load %arg2[%c85] : memref<98xf32, #tpu.memory_space<smem>>
    %c86 = arith.constant 86 : index
    %96 = memref.load %arg2[%c86] : memref<98xf32, #tpu.memory_space<smem>>
    %c87 = arith.constant 87 : index
    %97 = memref.load %arg2[%c87] : memref<98xf32, #tpu.memory_space<smem>>
    %c88 = arith.constant 88 : index
    %98 = memref.load %arg2[%c88] : memref<98xf32, #tpu.memory_space<smem>>
    %c89 = arith.constant 89 : index
    %99 = memref.load %arg2[%c89] : memref<98xf32, #tpu.memory_space<smem>>
    %c90 = arith.constant 90 : index
    %100 = memref.load %arg2[%c90] : memref<98xf32, #tpu.memory_space<smem>>
    %c91 = arith.constant 91 : index
    %101 = memref.load %arg2[%c91] : memref<98xf32, #tpu.memory_space<smem>>
    %c92 = arith.constant 92 : index
    %102 = memref.load %arg2[%c92] : memref<98xf32, #tpu.memory_space<smem>>
    %c93 = arith.constant 93 : index
    %103 = memref.load %arg2[%c93] : memref<98xf32, #tpu.memory_space<smem>>
    %c94 = arith.constant 94 : index
    %104 = memref.load %arg2[%c94] : memref<98xf32, #tpu.memory_space<smem>>
    %c95 = arith.constant 95 : index
    %105 = memref.load %arg2[%c95] : memref<98xf32, #tpu.memory_space<smem>>
    %c96 = arith.constant 96 : index
    %106 = memref.load %arg2[%c96] : memref<98xf32, #tpu.memory_space<smem>>
    %c97 = arith.constant 97 : index
    %107 = memref.load %arg2[%c97] : memref<98xf32, #tpu.memory_space<smem>>
    %cst_5 = arith.constant 0.000000e+00 : f32
    %108 = vector.broadcast %cst_5 : f32 to vector<2x256xf32>
    %cst_6 = arith.constant 0.000000e+00 : f32
    %109 = vector.broadcast %cst_6 : f32 to vector<2x256xf32>
    %cst_7 = arith.constant 0.000000e+00 : f32
    %110 = vector.broadcast %cst_7 : f32 to vector<2x256xf32>
    %cst_8 = arith.constant 0.000000e+00 : f32
    %111 = vector.broadcast %cst_8 : f32 to vector<2x256xf32>
    %cst_9 = arith.constant 0.000000e+00 : f32
    %112 = vector.broadcast %cst_9 : f32 to vector<2x256xf32>
    %cst_10 = arith.constant 0.000000e+00 : f32
    %113 = vector.broadcast %cst_10 : f32 to vector<2x256xf32>
    %cst_11 = arith.constant 0.000000e+00 : f32
    %114 = vector.broadcast %cst_11 : f32 to vector<2x256xf32>
    %c3_i32 = arith.constant 3 : i32
    %115 = vector.broadcast %c3_i32 : i32 to vector<2x256xi32>
    %116 = arith.cmpi sge, %7, %115 : vector<2x256xi32>
    %c3_i32_12 = arith.constant 3 : i32
    %117 = tpu.dynamic_rotate %4 by %c3_i32_12 dim 1 : vector<2x256xf32>, i32 -> vector<2x256xf32>
    %cst_13 = arith.constant 0.000000e+00 : f32
    %118 = vector.broadcast %cst_13 : f32 to vector<2x256xf32>
    %119 = arith.select %116, %117, %118 : vector<2x256xi1>, vector<2x256xf32>
    %c3_i32_14 = arith.constant 3 : i32
    %120 = tpu.dynamic_rotate %2 by %c3_i32_14 dim 1 : vector<2x256xf32>, i32 -> vector<2x256xf32>
    %cst_15 = arith.constant 0.000000e+00 : f32
    %121 = vector.broadcast %cst_15 : f32 to vector<2x256xf32>
    %122 = arith.select %116, %120, %121 : vector<2x256xi1>, vector<2x256xf32>
    %123 = vector.broadcast %10 : f32 to vector<2x256xf32>
    %124 = arith.mulf %123, %119 : vector<2x256xf32>
    %125 = arith.addf %108, %124 : vector<2x256xf32>
    %126 = vector.broadcast %59 : f32 to vector<2x256xf32>
    %127 = arith.mulf %126, %122 : vector<2x256xf32>
    %128 = arith.addf %125, %127 : vector<2x256xf32>
    %129 = vector.broadcast %17 : f32 to vector<2x256xf32>
    %130 = arith.mulf %129, %119 : vector<2x256xf32>
    %131 = arith.addf %109, %130 : vector<2x256xf32>
    %132 = vector.broadcast %66 : f32 to vector<2x256xf32>
    %133 = arith.mulf %132, %122 : vector<2x256xf32>
    %134 = arith.addf %131, %133 : vector<2x256xf32>
    %135 = vector.broadcast %24 : f32 to vector<2x256xf32>
    %136 = arith.mulf %135, %119 : vector<2x256xf32>
    %137 = arith.addf %110, %136 : vector<2x256xf32>
    %138 = vector.broadcast %73 : f32 to vector<2x256xf32>
    %139 = arith.mulf %138, %122 : vector<2x256xf32>
    %140 = arith.addf %137, %139 : vector<2x256xf32>
    %141 = vector.broadcast %31 : f32 to vector<2x256xf32>
    %142 = arith.mulf %141, %119 : vector<2x256xf32>
    %143 = arith.addf %111, %142 : vector<2x256xf32>
    %144 = vector.broadcast %80 : f32 to vector<2x256xf32>
    %145 = arith.mulf %144, %122 : vector<2x256xf32>
    %146 = arith.addf %143, %145 : vector<2x256xf32>
    %147 = vector.broadcast %38 : f32 to vector<2x256xf32>
    %148 = arith.mulf %147, %119 : vector<2x256xf32>
    %149 = arith.addf %112, %148 : vector<2x256xf32>
    %150 = vector.broadcast %87 : f32 to vector<2x256xf32>
    %151 = arith.mulf %150, %122 : vector<2x256xf32>
    %152 = arith.addf %149, %151 : vector<2x256xf32>
    %153 = vector.broadcast %45 : f32 to vector<2x256xf32>
    %154 = arith.mulf %153, %119 : vector<2x256xf32>
    %155 = arith.addf %113, %154 : vector<2x256xf32>
    %156 = vector.broadcast %94 : f32 to vector<2x256xf32>
    %157 = arith.mulf %156, %122 : vector<2x256xf32>
    %158 = arith.addf %155, %157 : vector<2x256xf32>
    %159 = vector.broadcast %52 : f32 to vector<2x256xf32>
    %160 = arith.mulf %159, %119 : vector<2x256xf32>
    %161 = arith.addf %114, %160 : vector<2x256xf32>
    %162 = vector.broadcast %101 : f32 to vector<2x256xf32>
    %163 = arith.mulf %162, %122 : vector<2x256xf32>
    %164 = arith.addf %161, %163 : vector<2x256xf32>
    %c2_i32 = arith.constant 2 : i32
    %165 = vector.broadcast %c2_i32 : i32 to vector<2x256xi32>
    %166 = arith.cmpi sge, %7, %165 : vector<2x256xi32>
    %c2_i32_16 = arith.constant 2 : i32
    %167 = tpu.dynamic_rotate %4 by %c2_i32_16 dim 1 : vector<2x256xf32>, i32 -> vector<2x256xf32>
    %cst_17 = arith.constant 0.000000e+00 : f32
    %168 = vector.broadcast %cst_17 : f32 to vector<2x256xf32>
    %169 = arith.select %166, %167, %168 : vector<2x256xi1>, vector<2x256xf32>
    %c2_i32_18 = arith.constant 2 : i32
    %170 = tpu.dynamic_rotate %2 by %c2_i32_18 dim 1 : vector<2x256xf32>, i32 -> vector<2x256xf32>
    %cst_19 = arith.constant 0.000000e+00 : f32
    %171 = vector.broadcast %cst_19 : f32 to vector<2x256xf32>
    %172 = arith.select %166, %170, %171 : vector<2x256xi1>, vector<2x256xf32>
    %173 = vector.broadcast %11 : f32 to vector<2x256xf32>
    %174 = arith.mulf %173, %169 : vector<2x256xf32>
    %175 = arith.addf %128, %174 : vector<2x256xf32>
    %176 = vector.broadcast %60 : f32 to vector<2x256xf32>
    %177 = arith.mulf %176, %172 : vector<2x256xf32>
    %178 = arith.addf %175, %177 : vector<2x256xf32>
    %179 = vector.broadcast %18 : f32 to vector<2x256xf32>
    %180 = arith.mulf %179, %169 : vector<2x256xf32>
    %181 = arith.addf %134, %180 : vector<2x256xf32>
    %182 = vector.broadcast %67 : f32 to vector<2x256xf32>
    %183 = arith.mulf %182, %172 : vector<2x256xf32>
    %184 = arith.addf %181, %183 : vector<2x256xf32>
    %185 = vector.broadcast %25 : f32 to vector<2x256xf32>
    %186 = arith.mulf %185, %169 : vector<2x256xf32>
    %187 = arith.addf %140, %186 : vector<2x256xf32>
    %188 = vector.broadcast %74 : f32 to vector<2x256xf32>
    %189 = arith.mulf %188, %172 : vector<2x256xf32>
    %190 = arith.addf %187, %189 : vector<2x256xf32>
    %191 = vector.broadcast %32 : f32 to vector<2x256xf32>
    %192 = arith.mulf %191, %169 : vector<2x256xf32>
    %193 = arith.addf %146, %192 : vector<2x256xf32>
    %194 = vector.broadcast %81 : f32 to vector<2x256xf32>
    %195 = arith.mulf %194, %172 : vector<2x256xf32>
    %196 = arith.addf %193, %195 : vector<2x256xf32>
    %197 = vector.broadcast %39 : f32 to vector<2x256xf32>
    %198 = arith.mulf %197, %169 : vector<2x256xf32>
    %199 = arith.addf %152, %198 : vector<2x256xf32>
    %200 = vector.broadcast %88 : f32 to vector<2x256xf32>
    %201 = arith.mulf %200, %172 : vector<2x256xf32>
    %202 = arith.addf %199, %201 : vector<2x256xf32>
    %203 = vector.broadcast %46 : f32 to vector<2x256xf32>
    %204 = arith.mulf %203, %169 : vector<2x256xf32>
    %205 = arith.addf %158, %204 : vector<2x256xf32>
    %206 = vector.broadcast %95 : f32 to vector<2x256xf32>
    %207 = arith.mulf %206, %172 : vector<2x256xf32>
    %208 = arith.addf %205, %207 : vector<2x256xf32>
    %209 = vector.broadcast %53 : f32 to vector<2x256xf32>
    %210 = arith.mulf %209, %169 : vector<2x256xf32>
    %211 = arith.addf %164, %210 : vector<2x256xf32>
    %212 = vector.broadcast %102 : f32 to vector<2x256xf32>
    %213 = arith.mulf %212, %172 : vector<2x256xf32>
    %214 = arith.addf %211, %213 : vector<2x256xf32>
    %c1_i32 = arith.constant 1 : i32
    %215 = vector.broadcast %c1_i32 : i32 to vector<2x256xi32>
    %216 = arith.cmpi sge, %7, %215 : vector<2x256xi32>
    %c1_i32_20 = arith.constant 1 : i32
    %217 = tpu.dynamic_rotate %4 by %c1_i32_20 dim 1 : vector<2x256xf32>, i32 -> vector<2x256xf32>
    %cst_21 = arith.constant 0.000000e+00 : f32
    %218 = vector.broadcast %cst_21 : f32 to vector<2x256xf32>
    %219 = arith.select %216, %217, %218 : vector<2x256xi1>, vector<2x256xf32>
    %c1_i32_22 = arith.constant 1 : i32
    %220 = tpu.dynamic_rotate %2 by %c1_i32_22 dim 1 : vector<2x256xf32>, i32 -> vector<2x256xf32>
    %cst_23 = arith.constant 0.000000e+00 : f32
    %221 = vector.broadcast %cst_23 : f32 to vector<2x256xf32>
    %222 = arith.select %216, %220, %221 : vector<2x256xi1>, vector<2x256xf32>
    %223 = vector.broadcast %12 : f32 to vector<2x256xf32>
    %224 = arith.mulf %223, %219 : vector<2x256xf32>
    %225 = arith.addf %178, %224 : vector<2x256xf32>
    %226 = vector.broadcast %61 : f32 to vector<2x256xf32>
    %227 = arith.mulf %226, %222 : vector<2x256xf32>
    %228 = arith.addf %225, %227 : vector<2x256xf32>
    %229 = vector.broadcast %19 : f32 to vector<2x256xf32>
    %230 = arith.mulf %229, %219 : vector<2x256xf32>
    %231 = arith.addf %184, %230 : vector<2x256xf32>
    %232 = vector.broadcast %68 : f32 to vector<2x256xf32>
    %233 = arith.mulf %232, %222 : vector<2x256xf32>
    %234 = arith.addf %231, %233 : vector<2x256xf32>
    %235 = vector.broadcast %26 : f32 to vector<2x256xf32>
    %236 = arith.mulf %235, %219 : vector<2x256xf32>
    %237 = arith.addf %190, %236 : vector<2x256xf32>
    %238 = vector.broadcast %75 : f32 to vector<2x256xf32>
    %239 = arith.mulf %238, %222 : vector<2x256xf32>
    %240 = arith.addf %237, %239 : vector<2x256xf32>
    %241 = vector.broadcast %33 : f32 to vector<2x256xf32>
    %242 = arith.mulf %241, %219 : vector<2x256xf32>
    %243 = arith.addf %196, %242 : vector<2x256xf32>
    %244 = vector.broadcast %82 : f32 to vector<2x256xf32>
    %245 = arith.mulf %244, %222 : vector<2x256xf32>
    %246 = arith.addf %243, %245 : vector<2x256xf32>
    %247 = vector.broadcast %40 : f32 to vector<2x256xf32>
    %248 = arith.mulf %247, %219 : vector<2x256xf32>
    %249 = arith.addf %202, %248 : vector<2x256xf32>
    %250 = vector.broadcast %89 : f32 to vector<2x256xf32>
    %251 = arith.mulf %250, %222 : vector<2x256xf32>
    %252 = arith.addf %249, %251 : vector<2x256xf32>
    %253 = vector.broadcast %47 : f32 to vector<2x256xf32>
    %254 = arith.mulf %253, %219 : vector<2x256xf32>
    %255 = arith.addf %208, %254 : vector<2x256xf32>
    %256 = vector.broadcast %96 : f32 to vector<2x256xf32>
    %257 = arith.mulf %256, %222 : vector<2x256xf32>
    %258 = arith.addf %255, %257 : vector<2x256xf32>
    %259 = vector.broadcast %54 : f32 to vector<2x256xf32>
    %260 = arith.mulf %259, %219 : vector<2x256xf32>
    %261 = arith.addf %214, %260 : vector<2x256xf32>
    %262 = vector.broadcast %103 : f32 to vector<2x256xf32>
    %263 = arith.mulf %262, %222 : vector<2x256xf32>
    %264 = arith.addf %261, %263 : vector<2x256xf32>
    %265 = vector.broadcast %13 : f32 to vector<2x256xf32>
    %266 = arith.mulf %265, %4 : vector<2x256xf32>
    %267 = arith.addf %228, %266 : vector<2x256xf32>
    %268 = vector.broadcast %62 : f32 to vector<2x256xf32>
    %269 = arith.mulf %268, %2 : vector<2x256xf32>
    %270 = arith.addf %267, %269 : vector<2x256xf32>
    %271 = vector.broadcast %20 : f32 to vector<2x256xf32>
    %272 = arith.mulf %271, %4 : vector<2x256xf32>
    %273 = arith.addf %234, %272 : vector<2x256xf32>
    %274 = vector.broadcast %69 : f32 to vector<2x256xf32>
    %275 = arith.mulf %274, %2 : vector<2x256xf32>
    %276 = arith.addf %273, %275 : vector<2x256xf32>
    %277 = vector.broadcast %27 : f32 to vector<2x256xf32>
    %278 = arith.mulf %277, %4 : vector<2x256xf32>
    %279 = arith.addf %240, %278 : vector<2x256xf32>
    %280 = vector.broadcast %76 : f32 to vector<2x256xf32>
    %281 = arith.mulf %280, %2 : vector<2x256xf32>
    %282 = arith.addf %279, %281 : vector<2x256xf32>
    %283 = vector.broadcast %34 : f32 to vector<2x256xf32>
    %284 = arith.mulf %283, %4 : vector<2x256xf32>
    %285 = arith.addf %246, %284 : vector<2x256xf32>
    %286 = vector.broadcast %83 : f32 to vector<2x256xf32>
    %287 = arith.mulf %286, %2 : vector<2x256xf32>
    %288 = arith.addf %285, %287 : vector<2x256xf32>
    %289 = vector.broadcast %41 : f32 to vector<2x256xf32>
    %290 = arith.mulf %289, %4 : vector<2x256xf32>
    %291 = arith.addf %252, %290 : vector<2x256xf32>
    %292 = vector.broadcast %90 : f32 to vector<2x256xf32>
    %293 = arith.mulf %292, %2 : vector<2x256xf32>
    %294 = arith.addf %291, %293 : vector<2x256xf32>
    %295 = vector.broadcast %48 : f32 to vector<2x256xf32>
    %296 = arith.mulf %295, %4 : vector<2x256xf32>
    %297 = arith.addf %258, %296 : vector<2x256xf32>
    %298 = vector.broadcast %97 : f32 to vector<2x256xf32>
    %299 = arith.mulf %298, %2 : vector<2x256xf32>
    %300 = arith.addf %297, %299 : vector<2x256xf32>
    %301 = vector.broadcast %55 : f32 to vector<2x256xf32>
    %302 = arith.mulf %301, %4 : vector<2x256xf32>
    %303 = arith.addf %264, %302 : vector<2x256xf32>
    %304 = vector.broadcast %104 : f32 to vector<2x256xf32>
    %305 = arith.mulf %304, %2 : vector<2x256xf32>
    %306 = arith.addf %303, %305 : vector<2x256xf32>
    %c15_i32_24 = arith.constant 15 : i32
    %307 = vector.broadcast %c15_i32_24 : i32 to vector<2x256xi32>
    %308 = arith.cmpi slt, %7, %307 : vector<2x256xi32>
    %c255_i32 = arith.constant 255 : i32
    %309 = tpu.dynamic_rotate %4 by %c255_i32 dim 1 : vector<2x256xf32>, i32 -> vector<2x256xf32>
    %cst_25 = arith.constant 0.000000e+00 : f32
    %310 = vector.broadcast %cst_25 : f32 to vector<2x256xf32>
    %311 = arith.select %308, %309, %310 : vector<2x256xi1>, vector<2x256xf32>
    %c255_i32_26 = arith.constant 255 : i32
    %312 = tpu.dynamic_rotate %2 by %c255_i32_26 dim 1 : vector<2x256xf32>, i32 -> vector<2x256xf32>
    %cst_27 = arith.constant 0.000000e+00 : f32
    %313 = vector.broadcast %cst_27 : f32 to vector<2x256xf32>
    %314 = arith.select %308, %312, %313 : vector<2x256xi1>, vector<2x256xf32>
    %315 = vector.broadcast %14 : f32 to vector<2x256xf32>
    %316 = arith.mulf %315, %311 : vector<2x256xf32>
    %317 = arith.addf %270, %316 : vector<2x256xf32>
    %318 = vector.broadcast %63 : f32 to vector<2x256xf32>
    %319 = arith.mulf %318, %314 : vector<2x256xf32>
    %320 = arith.addf %317, %319 : vector<2x256xf32>
    %321 = vector.broadcast %21 : f32 to vector<2x256xf32>
    %322 = arith.mulf %321, %311 : vector<2x256xf32>
    %323 = arith.addf %276, %322 : vector<2x256xf32>
    %324 = vector.broadcast %70 : f32 to vector<2x256xf32>
    %325 = arith.mulf %324, %314 : vector<2x256xf32>
    %326 = arith.addf %323, %325 : vector<2x256xf32>
    %327 = vector.broadcast %28 : f32 to vector<2x256xf32>
    %328 = arith.mulf %327, %311 : vector<2x256xf32>
    %329 = arith.addf %282, %328 : vector<2x256xf32>
    %330 = vector.broadcast %77 : f32 to vector<2x256xf32>
    %331 = arith.mulf %330, %314 : vector<2x256xf32>
    %332 = arith.addf %329, %331 : vector<2x256xf32>
    %333 = vector.broadcast %35 : f32 to vector<2x256xf32>
    %334 = arith.mulf %333, %311 : vector<2x256xf32>
    %335 = arith.addf %288, %334 : vector<2x256xf32>
    %336 = vector.broadcast %84 : f32 to vector<2x256xf32>
    %337 = arith.mulf %336, %314 : vector<2x256xf32>
    %338 = arith.addf %335, %337 : vector<2x256xf32>
    %339 = vector.broadcast %42 : f32 to vector<2x256xf32>
    %340 = arith.mulf %339, %311 : vector<2x256xf32>
    %341 = arith.addf %294, %340 : vector<2x256xf32>
    %342 = vector.broadcast %91 : f32 to vector<2x256xf32>
    %343 = arith.mulf %342, %314 : vector<2x256xf32>
    %344 = arith.addf %341, %343 : vector<2x256xf32>
    %345 = vector.broadcast %49 : f32 to vector<2x256xf32>
    %346 = arith.mulf %345, %311 : vector<2x256xf32>
    %347 = arith.addf %300, %346 : vector<2x256xf32>
    %348 = vector.broadcast %98 : f32 to vector<2x256xf32>
    %349 = arith.mulf %348, %314 : vector<2x256xf32>
    %350 = arith.addf %347, %349 : vector<2x256xf32>
    %351 = vector.broadcast %56 : f32 to vector<2x256xf32>
    %352 = arith.mulf %351, %311 : vector<2x256xf32>
    %353 = arith.addf %306, %352 : vector<2x256xf32>
    %354 = vector.broadcast %105 : f32 to vector<2x256xf32>
    %355 = arith.mulf %354, %314 : vector<2x256xf32>
    %356 = arith.addf %353, %355 : vector<2x256xf32>
    %c14_i32 = arith.constant 14 : i32
    %357 = vector.broadcast %c14_i32 : i32 to vector<2x256xi32>
    %358 = arith.cmpi slt, %7, %357 : vector<2x256xi32>
    %c254_i32 = arith.constant 254 : i32
    %359 = tpu.dynamic_rotate %4 by %c254_i32 dim 1 : vector<2x256xf32>, i32 -> vector<2x256xf32>
    %cst_28 = arith.constant 0.000000e+00 : f32
    %360 = vector.broadcast %cst_28 : f32 to vector<2x256xf32>
    %361 = arith.select %358, %359, %360 : vector<2x256xi1>, vector<2x256xf32>
    %c254_i32_29 = arith.constant 254 : i32
    %362 = tpu.dynamic_rotate %2 by %c254_i32_29 dim 1 : vector<2x256xf32>, i32 -> vector<2x256xf32>
    %cst_30 = arith.constant 0.000000e+00 : f32
    %363 = vector.broadcast %cst_30 : f32 to vector<2x256xf32>
    %364 = arith.select %358, %362, %363 : vector<2x256xi1>, vector<2x256xf32>
    %365 = vector.broadcast %15 : f32 to vector<2x256xf32>
    %366 = arith.mulf %365, %361 : vector<2x256xf32>
    %367 = arith.addf %320, %366 : vector<2x256xf32>
    %368 = vector.broadcast %64 : f32 to vector<2x256xf32>
    %369 = arith.mulf %368, %364 : vector<2x256xf32>
    %370 = arith.addf %367, %369 : vector<2x256xf32>
    %371 = vector.broadcast %22 : f32 to vector<2x256xf32>
    %372 = arith.mulf %371, %361 : vector<2x256xf32>
    %373 = arith.addf %326, %372 : vector<2x256xf32>
    %374 = vector.broadcast %71 : f32 to vector<2x256xf32>
    %375 = arith.mulf %374, %364 : vector<2x256xf32>
    %376 = arith.addf %373, %375 : vector<2x256xf32>
    %377 = vector.broadcast %29 : f32 to vector<2x256xf32>
    %378 = arith.mulf %377, %361 : vector<2x256xf32>
    %379 = arith.addf %332, %378 : vector<2x256xf32>
    %380 = vector.broadcast %78 : f32 to vector<2x256xf32>
    %381 = arith.mulf %380, %364 : vector<2x256xf32>
    %382 = arith.addf %379, %381 : vector<2x256xf32>
    %383 = vector.broadcast %36 : f32 to vector<2x256xf32>
    %384 = arith.mulf %383, %361 : vector<2x256xf32>
    %385 = arith.addf %338, %384 : vector<2x256xf32>
    %386 = vector.broadcast %85 : f32 to vector<2x256xf32>
    %387 = arith.mulf %386, %364 : vector<2x256xf32>
    %388 = arith.addf %385, %387 : vector<2x256xf32>
    %389 = vector.broadcast %43 : f32 to vector<2x256xf32>
    %390 = arith.mulf %389, %361 : vector<2x256xf32>
    %391 = arith.addf %344, %390 : vector<2x256xf32>
    %392 = vector.broadcast %92 : f32 to vector<2x256xf32>
    %393 = arith.mulf %392, %364 : vector<2x256xf32>
    %394 = arith.addf %391, %393 : vector<2x256xf32>
    %395 = vector.broadcast %50 : f32 to vector<2x256xf32>
    %396 = arith.mulf %395, %361 : vector<2x256xf32>
    %397 = arith.addf %350, %396 : vector<2x256xf32>
    %398 = vector.broadcast %99 : f32 to vector<2x256xf32>
    %399 = arith.mulf %398, %364 : vector<2x256xf32>
    %400 = arith.addf %397, %399 : vector<2x256xf32>
    %401 = vector.broadcast %57 : f32 to vector<2x256xf32>
    %402 = arith.mulf %401, %361 : vector<2x256xf32>
    %403 = arith.addf %356, %402 : vector<2x256xf32>
    %404 = vector.broadcast %106 : f32 to vector<2x256xf32>
    %405 = arith.mulf %404, %364 : vector<2x256xf32>
    %406 = arith.addf %403, %405 : vector<2x256xf32>
    %c13_i32 = arith.constant 13 : i32
    %407 = vector.broadcast %c13_i32 : i32 to vector<2x256xi32>
    %408 = arith.cmpi slt, %7, %407 : vector<2x256xi32>
    %c253_i32 = arith.constant 253 : i32
    %409 = tpu.dynamic_rotate %4 by %c253_i32 dim 1 : vector<2x256xf32>, i32 -> vector<2x256xf32>
    %cst_31 = arith.constant 0.000000e+00 : f32
    %410 = vector.broadcast %cst_31 : f32 to vector<2x256xf32>
    %411 = arith.select %408, %409, %410 : vector<2x256xi1>, vector<2x256xf32>
    %c253_i32_32 = arith.constant 253 : i32
    %412 = tpu.dynamic_rotate %2 by %c253_i32_32 dim 1 : vector<2x256xf32>, i32 -> vector<2x256xf32>
    %cst_33 = arith.constant 0.000000e+00 : f32
    %413 = vector.broadcast %cst_33 : f32 to vector<2x256xf32>
    %414 = arith.select %408, %412, %413 : vector<2x256xi1>, vector<2x256xf32>
    %415 = vector.broadcast %16 : f32 to vector<2x256xf32>
    %416 = arith.mulf %415, %411 : vector<2x256xf32>
    %417 = arith.addf %370, %416 : vector<2x256xf32>
    %418 = vector.broadcast %65 : f32 to vector<2x256xf32>
    %419 = arith.mulf %418, %414 : vector<2x256xf32>
    %420 = arith.addf %417, %419 : vector<2x256xf32>
    %421 = vector.broadcast %23 : f32 to vector<2x256xf32>
    %422 = arith.mulf %421, %411 : vector<2x256xf32>
    %423 = arith.addf %376, %422 : vector<2x256xf32>
    %424 = vector.broadcast %72 : f32 to vector<2x256xf32>
    %425 = arith.mulf %424, %414 : vector<2x256xf32>
    %426 = arith.addf %423, %425 : vector<2x256xf32>
    %427 = vector.broadcast %30 : f32 to vector<2x256xf32>
    %428 = arith.mulf %427, %411 : vector<2x256xf32>
    %429 = arith.addf %382, %428 : vector<2x256xf32>
    %430 = vector.broadcast %79 : f32 to vector<2x256xf32>
    %431 = arith.mulf %430, %414 : vector<2x256xf32>
    %432 = arith.addf %429, %431 : vector<2x256xf32>
    %433 = vector.broadcast %37 : f32 to vector<2x256xf32>
    %434 = arith.mulf %433, %411 : vector<2x256xf32>
    %435 = arith.addf %388, %434 : vector<2x256xf32>
    %436 = vector.broadcast %86 : f32 to vector<2x256xf32>
    %437 = arith.mulf %436, %414 : vector<2x256xf32>
    %438 = arith.addf %435, %437 : vector<2x256xf32>
    %439 = vector.broadcast %44 : f32 to vector<2x256xf32>
    %440 = arith.mulf %439, %411 : vector<2x256xf32>
    %441 = arith.addf %394, %440 : vector<2x256xf32>
    %442 = vector.broadcast %93 : f32 to vector<2x256xf32>
    %443 = arith.mulf %442, %414 : vector<2x256xf32>
    %444 = arith.addf %441, %443 : vector<2x256xf32>
    %445 = vector.broadcast %51 : f32 to vector<2x256xf32>
    %446 = arith.mulf %445, %411 : vector<2x256xf32>
    %447 = arith.addf %400, %446 : vector<2x256xf32>
    %448 = vector.broadcast %100 : f32 to vector<2x256xf32>
    %449 = arith.mulf %448, %414 : vector<2x256xf32>
    %450 = arith.addf %447, %449 : vector<2x256xf32>
    %451 = vector.broadcast %58 : f32 to vector<2x256xf32>
    %452 = arith.mulf %451, %411 : vector<2x256xf32>
    %453 = arith.addf %406, %452 : vector<2x256xf32>
    %454 = vector.broadcast %107 : f32 to vector<2x256xf32>
    %455 = arith.mulf %454, %414 : vector<2x256xf32>
    %456 = arith.addf %453, %455 : vector<2x256xf32>
    %cst_34 = arith.constant 0.000000e+00 : f32
    %457 = vector.broadcast %cst_34 : f32 to vector<2x256xf32>
    %cst_35 = arith.constant 0.000000e+00 : f32
    %458 = vector.broadcast %cst_35 : f32 to vector<2x256xf32>
    %c3_i32_36 = arith.constant 3 : i32
    %459 = vector.broadcast %c3_i32_36 : i32 to vector<2x256xi32>
    %460 = arith.cmpi sge, %9, %459 : vector<2x256xi32>
    %c48_i32 = arith.constant 48 : i32
    %461 = tpu.dynamic_rotate %420 by %c48_i32 dim 1 : vector<2x256xf32>, i32 -> vector<2x256xf32>
    %cst_37 = arith.constant 0.000000e+00 : f32
    %462 = vector.broadcast %cst_37 : f32 to vector<2x256xf32>
    %463 = arith.select %460, %461, %462 : vector<2x256xi1>, vector<2x256xf32>
    %464 = arith.addf %457, %463 : vector<2x256xf32>
    %c2_i32_38 = arith.constant 2 : i32
    %465 = vector.broadcast %c2_i32_38 : i32 to vector<2x256xi32>
    %466 = arith.cmpi sge, %9, %465 : vector<2x256xi32>
    %c32_i32 = arith.constant 32 : i32
    %467 = tpu.dynamic_rotate %426 by %c32_i32 dim 1 : vector<2x256xf32>, i32 -> vector<2x256xf32>
    %cst_39 = arith.constant 0.000000e+00 : f32
    %468 = vector.broadcast %cst_39 : f32 to vector<2x256xf32>
    %469 = arith.select %466, %467, %468 : vector<2x256xi1>, vector<2x256xf32>
    %470 = arith.addf %458, %469 : vector<2x256xf32>
    %c1_i32_40 = arith.constant 1 : i32
    %471 = vector.broadcast %c1_i32_40 : i32 to vector<2x256xi32>
    %472 = arith.cmpi sge, %9, %471 : vector<2x256xi32>
    %c16_i32 = arith.constant 16 : i32
    %473 = tpu.dynamic_rotate %432 by %c16_i32 dim 1 : vector<2x256xf32>, i32 -> vector<2x256xf32>
    %cst_41 = arith.constant 0.000000e+00 : f32
    %474 = vector.broadcast %cst_41 : f32 to vector<2x256xf32>
    %475 = arith.select %472, %473, %474 : vector<2x256xi1>, vector<2x256xf32>
    %476 = arith.addf %464, %475 : vector<2x256xf32>
    %477 = arith.addf %470, %438 : vector<2x256xf32>
    %c15_i32_42 = arith.constant 15 : i32
    %478 = vector.broadcast %c15_i32_42 : i32 to vector<2x256xi32>
    %479 = arith.cmpi slt, %9, %478 : vector<2x256xi32>
    %c240_i32 = arith.constant 240 : i32
    %480 = tpu.dynamic_rotate %444 by %c240_i32 dim 1 : vector<2x256xf32>, i32 -> vector<2x256xf32>
    %cst_43 = arith.constant 0.000000e+00 : f32
    %481 = vector.broadcast %cst_43 : f32 to vector<2x256xf32>
    %482 = arith.select %479, %480, %481 : vector<2x256xi1>, vector<2x256xf32>
    %483 = arith.addf %476, %482 : vector<2x256xf32>
    %c14_i32_44 = arith.constant 14 : i32
    %484 = vector.broadcast %c14_i32_44 : i32 to vector<2x256xi32>
    %485 = arith.cmpi slt, %9, %484 : vector<2x256xi32>
    %c224_i32 = arith.constant 224 : i32
    %486 = tpu.dynamic_rotate %450 by %c224_i32 dim 1 : vector<2x256xf32>, i32 -> vector<2x256xf32>
    %cst_45 = arith.constant 0.000000e+00 : f32
    %487 = vector.broadcast %cst_45 : f32 to vector<2x256xf32>
    %488 = arith.select %485, %486, %487 : vector<2x256xi1>, vector<2x256xf32>
    %489 = arith.addf %477, %488 : vector<2x256xf32>
    %c13_i32_46 = arith.constant 13 : i32
    %490 = vector.broadcast %c13_i32_46 : i32 to vector<2x256xi32>
    %491 = arith.cmpi slt, %9, %490 : vector<2x256xi32>
    %c208_i32 = arith.constant 208 : i32
    %492 = tpu.dynamic_rotate %456 by %c208_i32 dim 1 : vector<2x256xf32>, i32 -> vector<2x256xf32>
    %cst_47 = arith.constant 0.000000e+00 : f32
    %493 = vector.broadcast %cst_47 : f32 to vector<2x256xf32>
    %494 = arith.select %491, %492, %493 : vector<2x256xi1>, vector<2x256xf32>
    %495 = arith.addf %483, %494 : vector<2x256xf32>
    %496 = arith.addf %495, %489 : vector<2x256xf32>
    %c0_48 = arith.constant 0 : index
    %c0_49 = arith.constant 0 : index
    %497 = vector.load %arg4[%c0_48, %c0_49] : memref<2x256xf32, #tpu.memory_space<vmem>>, vector<2x256xf32>
    tpu.vector_store %arg4[%c0_48, %c0_49], %496 {strides = array<i32>} : memref<2x256xf32, #tpu.memory_space<vmem>>, vector<2x256xf32>,
    return
  }
  func.func @transform_0(%arg0: i32, %arg1: i32) -> i32 {
    %c0_i32 = arith.constant 0 : i32
    %c0_i32_0 = arith.constant 0 : i32
    return %c0_i32 : i32
  }
  func.func @transform_1(%arg0: i32, %arg1: i32) -> (i32, i32, i32) {
    %c0_i32 = arith.constant 0 : i32
    %c0_i32_0 = arith.constant 0 : i32
    return %arg0, %arg1, %c0_i32 : i32, i32, i32
  }
  func.func @transform_2(%arg0: i32, %arg1: i32) -> (i32, i32) {
    %c0_i32 = arith.constant 0 : i32
    %c0_i32_0 = arith.constant 0 : i32
    return %arg0, %c0_i32 : i32, i32
  }
}

</mosaic_0001>

<bundles_post_ra>
// kernel: tpu_custom_call.1
= control target key start
LH: loop header
LB: loop body
LE: loop exit
PB: predicated region body
PF: predicated region fallthrough
CT: control target
= control target key end

     0   :  { %s2409_s0 = inlined_call_operand.hbm [shape: f32[98], index: 0, kind: input, shape index: {}]   ;;  %s2410_s1 = inlined_call_operand.hbm [shape: f32[2,4,256], index: 1, kind: input, shape index: {}]   ;;  %s2411_s2 = inlined_call_operand.hbm [shape: f32[2,256], index: 2, kind: output, shape index: {}]  }
   0x1   :  { %2446 = sst [smem:[#allocation34_spill]] %s2411_s2 }
   0x2   :  { %7 = vsyncpa [#allocation7], 0 }
   0x3   :  { %8 = vsyncpa [#allocation5], 0 }
   0x4   :  { %9 = vsyncpa [#allocation6], 0  ;;  %s15_s11 = sshll.u32 %s2409_s0, 4  ;;  %s23_s14 = sshll.u32 %s2410_s1, 4  ;;  %s16_s11 = int_to_ptr.hbm [resolvable:$true] %s15_s11  ;;  %s24_s14 = int_to_ptr.hbm [resolvable:$true] %s23_s14 }
   0x5   :  { %s1281_s15 = smov [#allocation4]   ;;  %s1282_s16 = smov [#allocation8]  }
   0x6   :  { %18 = dma.hbm_to_smem %s16_s11, 16, %s1281_s15, [#allocation7]  }
   0x7   :  { %s25_s17 = sshll.u32 %s1282_s16, 4  ;;  %s1283_s18 = smov 128   ;;  %s26_s17 = int_to_ptr.vmem [resolvable:$true] %s25_s17 }
   0x8   :  { %s1284_s19 = smov 8  }
   0x9   :  { %31 = dma.hbm_to_vmem [thread:$0]  %s24_s14, 256, %s26_s17, [#allocation5], %s1283_s18, %s1283_s18, %s1284_s19  }
   0xa   :  { %1275 = dma.done.wait [#allocation7], 16  }
   0xb   :  { %1276 = vsyncadd [#allocation7], 4294967280 }
   0xc   :  { %1277 = dma.done.wait [#allocation5], 256  }
   0xd   :  { %1278 = vsyncadd [#allocation5], 4294967040 }
   0xe   :  { %40 = sfence }
   0xf   :  { %v41_v0 = vld [vmem:[#allocation8] sm:$0xff]  ;;  %v42_v1 = vld [vmem:[#allocation8 + $0x8] sm:$0xff]  ;;  %vm56_vm0 = vcmask 1043456   ;;  %vm239_vm1 = vcmask 1041409   ;;  %s1285_s0 = smov 3   ;;  %s1286_s1 = smov 2  }
  0x10   :  { %45 = vst [vmem:[#allocation1] ss:$2 sm:$0xff] %v41_v0  ;;  %s1287_s20 = smov 1   ;;  %s1288_s21 = smov 127  }
  0x11   :  { %49 = vst [vmem:[#allocation1 + $0x10] ss:$2 sm:$0xff] %v42_v1  ;;  %s1289_s22 = smov 126   ;;  %s1290_s23 = smov 125  }
  0x12   :  { %s1355_s24 = sld [smem:[#allocation4 + $0x1]] }
  0x13   :  { %s1357_s25 = sld [smem:[#allocation4 + $0x8]] }
  0x14   :  { %s1359_s26 = sld [smem:[#allocation4 + $0xf]] }
  0x15   :  { %s1361_s27 = sld [smem:[#allocation4 + $0x16]] }
  0x16   :  { %s1363_s28 = sld [smem:[#allocation4 + $0x1d]] }
  0x17   :  { %v46_v2 = vld.sshfl [vmem:[#allocation1] sm:$0xff pattern:$0x75316420]  ;;  %v47_v3 = vld.sshfl [vmem:[#allocation1 + $0x8] sm:$0xff pattern:$0x75316420] }
  0x18   :  { %v50_v4 = vld.sshfl [vmem:[#allocation1 + $0x10] sm:$0xff pattern:$0x75316420]  ;;  %v51_v5 = vld.sshfl [vmem:[#allocation1 + $0x18] sm:$0xff pattern:$0x75316420] }
  0x19   :  { %v57_v6 = vsel %vm56_vm0, %v46_v2, 0.0  ;;  %v71_v7 = vsel %vm56_vm0, %v50_v4, 0.0  ;;  %85 = vst [vmem:[#allocation1] ss:$2 sm:$0xff] %v41_v0  ;;  %v64_v8 = vsel %vm56_vm0, %v47_v3, 0.0  ;;  %v78_v9 = vsel %vm56_vm0, %v51_v5, 0.0 }
  0x1a   :  { %v58_v10 = vrot.slane %v57_v6, 4  ;;  %v72_v11 = vrot.slane %v71_v7, 4  ;;  %89 = vst [vmem:[#allocation1 + $0x10] ss:$2 sm:$0xff] %v42_v1  ;;  %v65_v12 = vrot.slane %v64_v8, 4  ;;  %v79_v13 = vrot.slane %v78_v9, 4 }
  0x1b   :  { %s1365_s29 = sld [smem:[#allocation4 + $0x24]] }
  0x1c   :  { %v59_v14 = vadd.f32 %v58_v10, %v57_v6  ;;  %v73_v15 = vadd.f32 %v72_v11, %v71_v7  ;;  %v66_v16 = vadd.f32 %v65_v12, %v64_v8  ;;  %v80_v17 = vadd.f32 %v79_v13, %v78_v9  ;;  %s1367_s30 = sld [smem:[#allocation4 + $0x2b]] }
  0x1d   :  { %s1369_s3 = sld [smem:[#allocation4]]  ;;  %v128_v10 = vlaneseq }
  0x1e   :  { %v60_v18 = vrot.slane %v59_v14, 2  ;;  %v74_v19 = vrot.slane %v73_v15, 2  ;;  %v67_v20 = vrot.slane %v66_v16, 2  ;;  %v81_v21 = vrot.slane %v80_v17, 2  ;;  %s1371_s4 = sld [smem:[#allocation4 + $0x7]] }
  0x1f   :  { %s1373_s5 = sld [smem:[#allocation4 + $0xe]]  ;;  %v1393_v12 = vand.u32 127, %v128_v10 }
  0x20   :  { %v61_v22 = vadd.f32 %v60_v18, %v59_v14  ;;  %v75_v23 = vadd.f32 %v74_v19, %v73_v15  ;;  %v86_v24 = vld.sshfl [vmem:[#allocation1] sm:$0xff pattern:$0x75316420]  ;;  %v68_v25 = vadd.f32 %v67_v20, %v66_v16  ;;  %v82_v26 = vadd.f32 %v81_v21, %v80_v17  ;;  %v87_v27 = vld.sshfl [vmem:[#allocation1 + $0x8] sm:$0xff pattern:$0x75316420] }
  0x21   :  { %v90_v28 = vld.sshfl [vmem:[#allocation1 + $0x10] sm:$0xff pattern:$0x75316420]  ;;  %v96_v29 = vsel %vm56_vm0, %v86_v24, -inf  ;;  %v103_v30 = vsel %vm56_vm0, %v87_v27, -inf  ;;  %s1375_s6 = sld [smem:[#allocation4 + $0x15]]  ;;  %v358_v17 = vstv %s1355_s24  ;;  %v368_v18 = vstv %s1357_s25 }
  0x22   :  { %v62_v31 = vrot.slane %v61_v22, 1  ;;  %v76_v32 = vrot.slane %v75_v23, 1  ;;  %v97_v33 = vrot.slane %v96_v29, 4  ;;  %v110_v34 = vsel %vm56_vm0, %v90_v28, -inf  ;;  %s1377_s7 = sld [smem:[#allocation4 + $0x1c]]  ;;  %2455 = vst [vmem:[#allocation21_spill] sm:$0xff] %v1393_v12 }
  0x23   :  { %v111_v35 = vrot.slane %v110_v34, 4  ;;  %v69_v36 = vrot.slane %v68_v25, 1  ;;  %v83_v37 = vrot.slane %v82_v26, 1  ;;  %v91_v38 = vld.sshfl [vmem:[#allocation1 + $0x18] sm:$0xff pattern:$0x75316420]  ;;  %v378_v19 = vstv %s1359_s26 }
  0x24   :  { %v63_v39 = vadd.f32 %v62_v31, %v61_v22  ;;  %v77_v40 = vadd.f32 %v76_v32, %v75_v23  ;;  %v98_v41 = vmax.f32 %v96_v29, %v97_v33  ;;  %v104_v42 = vrot.slane %v103_v30, 4  ;;  %s1379_s8 = sld [smem:[#allocation4 + $0x23]] }
  0x25   :  { %v112_v43 = vmax.f32 %v110_v34, %v111_v35  ;;  %v70_v44 = vadd.f32 %v69_v36, %v68_v25  ;;  %v84_v45 = vadd.f32 %v83_v37, %v82_v26  ;;  %v117_v46 = vsel %vm56_vm0, %v91_v38, -inf  ;;  %s1381_s9 = sld [smem:[#allocation4 + $0x2a]] }
  0x26   :  { %v1327_v47 = vmul.f32 0.25, %v63_v39  ;;  %v1329_v48 = vmul.f32 0.25, %v77_v40  ;;  %v99_v49 = vrot.slane %v98_v41, 2  ;;  %v105_v50 = vmax.f32 %v103_v30, %v104_v42  ;;  %s1383_s10 = sld [smem:[#allocation4 + $0x31]] }
  0x27   :  { %v113_v51 = vrot.slane %v112_v43, 2  ;;  %v118_v52 = vrot.slane %v117_v46, 4  ;;  %v1334_v59 = vmul.f32 0.25, %v70_v44  ;;  %v1336_v60 = vmul.f32 0.25, %v84_v45  ;;  %s1385_s11 = sld [smem:[#allocation4 + $0x38]] }
  0x28   :  { %2447 = vst [vmem:[#allocation13_spill] sm:$0xff] %v1327_v47  ;;  %v240_v53 = vsel %vm239_vm1, %v1329_v48, %v1327_v47  ;;  %v100_v54 = vmax.f32 %v98_v41, %v99_v49  ;;  %v106_v55 = vrot.slane %v105_v50, 2  ;;  %s1387_s12 = sld [smem:[#allocation4 + $0x3f]]  ;;  %v1404_v13 = vadd.s32 128, %v1393_v12 }
  0x29   :  { %2448 = vst [vmem:[#allocation14_spill] sm:$0xff] %v1329_v48  ;;  %244 = vrot.lane.b32.xlu0 %v240_v53, %s1285_s0  ;;  %v114_v56 = vmax.f32 %v112_v43, %v113_v51  ;;  %v119_v57 = vmax.f32 %v117_v46, %v118_v52  ;;  %341 = vrot.lane.b32.xlu2 %v240_v53, %s1286_s1  ;;  %s1389_s13 = sld [smem:[#allocation4 + $0x46]]  ;;  %v1415_v14 = vand.u32 15, %v1393_v12  ;;  %vm345_vm2 = vcmp.lt.s32.totalorder %v1393_v12, 2 }
  0x2a   :  { %v101_v58 = vrot.slane %v100_v54, 1  ;;  %2449 = vst [vmem:[#allocation15_spill] sm:$0xff] %v1334_v59  ;;  %v107_v61 = vmax.f32 %v105_v50, %v106_v55  ;;  %v241_v4 = vsel %vm239_vm1, %v1336_v60, %v1334_v59  ;;  %s1391_s14 = sld [smem:[#allocation4 + $0x4d]]  ;;  %v1418_v15 = vand.u32 15, %v1404_v13 }
  0x2b   :  { %v115_v62 = vrot.slane %v114_v56, 1  ;;  %v120_v63 = vrot.slane %v119_v57, 2  ;;  %s1395_s15 = sld [smem:[#allocation4 + $0x54]]  ;;  %2458 = vst [vmem:[#allocation24_spill] sm:$0xff] %v1404_v13  ;;  %vm339_vm3 = vcmp.ge.s32.totalorder %v1415_v14, 2  ;;  %v388_v20 = vstv %s1361_s27 }
  0x2c   :  { %v1338_v0 = vmax.f32 %v100_v54, %v101_v58  ;;  %v108_v2 = vrot.slane %v107_v61, 1  ;;  %s1397_s16 = sld [smem:[#allocation4 + $0x5b]]  ;;  %vm340_vm4 = vcmp.ge.s32.totalorder %v1418_v15, 2  ;;  %v398_v21 = vstv %s1363_s28 }
  0x2d   :  { %v1340_v1 = vmax.f32 %v114_v56, %v115_v62  ;;  %v121_v3 = vmax.f32 %v119_v57, %v120_v63  ;;  %s1399_s17 = sld [smem:[#allocation4 + $0x2]]  ;;  %v408_v22 = vstv %s1365_s29  ;;  %v418_v25 = vstv %s1367_s30 }
  0x2e   :  { %2450 = vst [vmem:[#allocation16_spill] sm:$0xff] %v1338_v0  ;;  %v1348_v7 = vmax.f32 %v107_v61, %v108_v2  ;;  %s1401_s18 = sld [smem:[#allocation4 + $0x9]]  ;;  %vm233_vm5 = vcmp.ge.s32.totalorder %v1415_v14, 3  ;;  %vm234_vm6 = vcmp.ge.s32.totalorder %v1418_v15, 3  ;;  %vm248_vm7 = vcmp.lt.s32.totalorder %v1393_v12, 3 }
  0x2f   :  { %2451 = vst [vmem:[#allocation17_spill] sm:$0xff] %v1340_v1  ;;  %v257_v5 = vsel %vm239_vm1, %v1340_v1, %v1338_v0  ;;  %v122_v6 = vrot.slane %v121_v3, 1  ;;  %s1406_s19 = sld [smem:[#allocation4 + $0x10]]  ;;  %v269_v27 = vstv %s1369_s3  ;;  %v279_v28 = vstv %s1371_s4 }
  0x30   :  { %261 = vrot.lane.b32.xlu1 %v257_v5, %s1285_s0  ;;  %2452 = vst [vmem:[#allocation18_spill] sm:$0xff] %v1348_v7  ;;  %2454 = sst [smem:[#allocation20_spill]] %s1391_s14  ;;  %v289_v29 = vstv %s1373_s5  ;;  %v299_v30 = vstv %s1375_s6  ;;  %v309_v33 = vstv %s1377_s7  ;;  %vm434_vm8 = vcmp.lt.s32.totalorder %v1393_v12, 1 }
  0x31   :  { %246 = vrot.lane.b32.xlu0 %v241_v4, %s1285_s0  ;;  %v1350_v8 = vmax.f32 %v121_v3, %v122_v6  ;;  %343 = vrot.lane.b32.xlu2 %v241_v4, %s1286_s1  ;;  %2456 = sst [smem:[#allocation22_spill]] %s1395_s15  ;;  %v319_v34 = vstv %s1379_s8  ;;  %v329_v35 = vstv %s1381_s9  ;;  %vm428_vm9 = vcmp.ge.s32.totalorder %v1415_v14, 1 }
  0x32   :  { %2457 = sst [smem:[#allocation23_spill]] %s1397_s16  ;;  %v274_v36 = vstv %s1383_s10  ;;  %v284_v37 = vstv %s1385_s11  ;;  %v294_v38 = vstv %s1387_s12  ;;  %v304_v39 = vstv %s1389_s13 }
  0x33   :  { %2453 = vst [vmem:[#allocation19_spill] sm:$0xff] %v1350_v8  ;;  %v258_v9 = vsel %vm239_vm1, %v1350_v8, %v1348_v7  ;;  %s1429_s2 = sld [smem:[#allocation4 + $0x40]]  ;;  %v314_v40 = vstv %s1391_s14  ;;  %vm429_vm10 = vcmp.ge.s32.totalorder %v1418_v15, 1  ;;  %vm727_vm11 = vcmp.lt.s32.totalorder %v1415_v14, 15 }
  0x34   :  { %s1443_s24 = sld [smem:[#allocation4 + $0x4e]]  ;;  %vm728_vm12 = vcmp.lt.s32.totalorder %v1418_v15, 15  ;;  %vm733_vm13 = vcmp.lt.s32.totalorder %v1393_v12, 127  ;;  %vm816_vm14 = vcmp.lt.s32.totalorder %v1415_v14, 14  ;;  %vm822_vm15 = vcmp.lt.s32.totalorder %v1393_v12, 126 }
  0x35   :  { %s1449_s25 = sld [smem:[#allocation4 + $0x55]]  ;;  %vm817_vm0 = vcmp.lt.s32.totalorder %v1418_v15, 14 }
  0x36   :  { %s1455_s26 = sld [smem:[#allocation4 + $0x5c]] }
  0x37   :  { %s1463_s27 = sld [smem:[#allocation4 + $0x33]] }
  0x38   :  { %263 = vrot.lane.b32.xlu1 %v258_v9, %s1285_s0  ;;  %s1408_s0 = sld [smem:[#allocation4 + $0x17]] }
  0x39   :  { %432 = vrot.lane.b32.xlu0 %v241_v4, %s1287_s20  ;;  %430 = vrot.lane.b32.xlu2 %v240_v53, %s1287_s20  ;;  %s1469_s28 = sld [smem:[#allocation4 + $0x3a]] }
  0x3a   :  { %s1475_s29 = sld [smem:[#allocation4 + $0x41]] }
  0x3b   :  { %s1485_s30 = sld [smem:[#allocation4 + $0x48]] }
  0x3c   :  { %s1509_s15 = sld [smem:[#allocation4 + $0x18]] }
  0x3d   :  { %s1515_s14 = sld [smem:[#allocation4 + $0x4f]] }
  0x3e   :  { %s2464_s4 = sld [smem:[#allocation22_spill]] }
  0x3f   :  { %s2466_s5 = sld [smem:[#allocation23_spill]] }
  0x40   :  { %352 = vrot.lane.b32.xlu1 %v258_v9, %s1286_s1  ;;  %s1776_s8 = sld [smem:[#allocation4 + $0xb]] }
  0x41   :  { %350 = vrot.lane.b32.xlu0 %v257_v5, %s1286_s1  ;;  %441 = vrot.lane.b32.xlu2 %v258_v9, %s1287_s20  ;;  %s1410_s1 = sld [smem:[#allocation4 + $0x1e]] }
  0x42   :  { %s1786_s9 = sld [smem:[#allocation4 + $0x12]] }
  0x43   :  { %s1792_s10 = sld [smem:[#allocation4 + $0x19]] }
  0x44   :  { %v2467_v13 = vstv %s2464_s4  ;;  %s1802_s11 = sld [smem:[#allocation4 + $0x20]] }
  0x45   :  { %v2468_v0 = vmov %v2467_v13  ;;  %v2469_v7 = vstv %s2466_s5  ;;  %s1814_s12 = sld [smem:[#allocation4 + $0x27]] }
  0x46   :  { %s1820_s13 = sld [smem:[#allocation4 + $0x2e]] }
  0x47   :  { %2459 = sst [smem:[#allocation25_spill]] %s1410_s1 }
  0x48   :  { %439 = vrot.lane.b32.xlu1 %v257_v5, %s1287_s20  ;;  %s1412_s20 = sld [smem:[#allocation4 + $0x25]] }
  0x49   :  { %729 = vrot.lane.b32.xlu0 %v240_v53, %s1288_s21  ;;  %738 = vrot.lane.b32.xlu2 %v257_v5, %s1288_s21  ;;  %s1532_s1 = sld [smem:[#allocation4 + $0x5d]] }
  0x4a   :  { %s2471_s6 = sld [smem:[#allocation25_spill]] }
  0x4b   :  { %s2070_s3 = sld [smem:[#allocation4 + $0x3d]] }
  0x4c   :  { %s2080_s4 = sld [smem:[#allocation4 + $0xd]] }
  0x4d   :  { %s2085_s5 = sld [smem:[#allocation4 + $0x3e]] }
  0x4e   :  { %2460 = sst [smem:[#allocation26_spill]] %s1412_s20 }
  0x4f   :  { %s1524_s20 = sld [smem:[#allocation4 + $0x56]] }
  0x50   :  { %731 = vrot.lane.b32.xlu1 %v241_v4, %s1288_s21  ;;  %s2472_s7 = sld [smem:[#allocation26_spill]] }
  0x51   :  { %740 = vrot.lane.b32.xlu0 %v258_v9, %s1288_s21  ;;  %820 = vrot.lane.b32.xlu2 %v241_v4, %s1289_s22  ;;  %s1420_s21 = sld [smem:[#allocation4 + $0x2c]] }
  0x58   :  { %818 = vrot.lane.b32.xlu1 %v240_v53, %s1289_s22 }
  0x59   :  { %827 = vrot.lane.b32.xlu0 %v257_v5, %s1289_s22  ;;  %907 = vrot.lane.b32.xlu2 %v240_v53, %s1290_s23 }
  0x60   :  { %829 = vrot.lane.b32.xlu1 %v258_v9, %s1289_s22  ;;  %s1422_s22 = sld [smem:[#allocation4 + $0x32]] }
  0x61   :  { %909 = vrot.lane.b32.xlu0 %v241_v4, %s1290_s23  ;;  %918 = vrot.lane.b32.xlu2 %v258_v9, %s1290_s23 }
  0x66   :  { %2461 = sst [smem:[#allocation27_spill]] %s1422_s22 }
  0x67   :  { %s1435_s22 = sld [smem:[#allocation4 + $0x47]] }
  0x68   :  { %916 = vrot.lane.b32.xlu1 %v257_v5, %s1290_s23  ;;  %s1425_s23 = sld [smem:[#allocation4 + $0x39]] }
  0x69   :  { %s2462_s16 = sld [smem:[#allocation27_spill]] }
  0x83   :  { %v342_v11 = vpop.permute.xlu2 %341 }
  0x8b   :  { %v344_v16 = vpop.permute.xlu2 %343 }
  0x8c   :  { %v346_v23 = vsel %vm345_vm2, %v342_v11, %v344_v16  ;;  %v347_v24 = vsel %vm345_vm2, %v344_v16, %v342_v11 }
  0x8d   :  { %v348_v31 = vsel %vm339_vm3, %v347_v24, 0.0  ;;  %v349_v32 = vsel %vm340_vm4, %v346_v23, 0.0 }
  0x8e   :  { %v1477_v43 = vmul.f32 %v358_v17, %v348_v31  ;;  %v1479_v44 = vmul.f32 %v358_v17, %v349_v32  ;;  %v1481_v45 = vmul.f32 %v368_v18, %v348_v31  ;;  %v1483_v46 = vmul.f32 %v368_v18, %v349_v32 }
  0x8f   :  { %v1487_v49 = vmul.f32 %v378_v19, %v348_v31  ;;  %v1489_v50 = vmul.f32 %v378_v19, %v349_v32  ;;  %v1491_v51 = vmul.f32 %v388_v20, %v348_v31  ;;  %v1493_v52 = vmul.f32 %v388_v20, %v349_v32 }
  0x90   :  { %v1495_v53 = vmul.f32 %v398_v21, %v348_v31  ;;  %v1497_v54 = vmul.f32 %v398_v21, %v349_v32  ;;  %v1499_v55 = vmul.f32 %v408_v22, %v348_v31  ;;  %v1501_v56 = vmul.f32 %v408_v22, %v349_v32 }
  0x91   :  { %v1503_v58 = vmul.f32 %v418_v25, %v348_v31  ;;  %v1505_v61 = vmul.f32 %v418_v25, %v349_v32  ;;  %v1567_v20 = vstv %s1509_s15  ;;  %s1879_s15 = sld [smem:[#allocation4 + $0x3]] }
  0x93   :  { %v431_v16 = vpop.permute.xlu2 %430 }
  0x9b   :  { %v245_v26 = vpop.permute.xlu0 %244 }
  0xa2   :  { %v262_v57 = vpop.permute.xlu1 %261 }
  0xa3   :  { %v247_v2 = vpop.permute.xlu0 %246 }
  0xa4   :  { %v249_v9 = vsel %vm248_vm7, %v245_v26, %v247_v2  ;;  %v250_v10 = vsel %vm248_vm7, %v247_v2, %v245_v26 }
  0xa5   :  { %v251_v17 = vsel %vm233_vm5, %v250_v10, 0.0  ;;  %v252_v18 = vsel %vm234_vm6, %v249_v9, 0.0 }
  0xa6   :  { %v270_v2 = vmul.f32 %v269_v27, %v251_v17  ;;  %v271_v9 = vmul.f32 %v269_v27, %v252_v18  ;;  %v280_v10 = vmul.f32 %v279_v28, %v251_v17  ;;  %v281_v22 = vmul.f32 %v279_v28, %v252_v18 }
  0xa7   :  { %v290_v26 = vmul.f32 %v289_v29, %v251_v17  ;;  %v291_v31 = vmul.f32 %v289_v29, %v252_v18  ;;  %v300_v32 = vmul.f32 %v299_v30, %v251_v17  ;;  %v301_v25 = vmul.f32 %v299_v30, %v252_v18 }
  0xa8   :  { %v310_v27 = vmul.f32 %v309_v33, %v251_v17  ;;  %v311_v28 = vmul.f32 %v309_v33, %v252_v18  ;;  %v320_v24 = vmul.f32 %v319_v34, %v251_v17  ;;  %v321_v29 = vmul.f32 %v319_v34, %v252_v18 }
  0xa9   :  { %v330_v21 = vmul.f32 %v329_v35, %v251_v17  ;;  %v331_v11 = vmul.f32 %v329_v35, %v252_v18  ;;  %v1592_v35 = vmul.f32 %v1567_v20, %v1334_v59 }
  0xaa   :  { %v264_v23 = vpop.permute.xlu1 %263 }
  0xab   :  { %v265_v30 = vsel %vm248_vm7, %v262_v57, %v264_v23  ;;  %v266_v33 = vsel %vm248_vm7, %v264_v23, %v262_v57  ;;  %v433_v19 = vpop.permute.xlu0 %432  ;;  %v1588_v57 = vmul.f32 %v1567_v20, %v1327_v47  ;;  %2465 = vst [vmem:[#allocation28_spill] sm:$0xff] %v1592_v35  ;;  %v2470_v35 = vmov %v2469_v7 }
  0xac   :  { %v267_v34 = vsel %vm233_vm5, %v266_v33, 0.0  ;;  %v268_v17 = vsel %vm234_vm6, %v265_v30, 0.0  ;;  %v435_v6 = vsel %vm434_vm8, %v431_v16, %v433_v19  ;;  %v436_v3 = vsel %vm434_vm8, %v433_v19, %v431_v16 }
  0xad   :  { %v275_v18 = vmul.f32 %v274_v36, %v267_v34  ;;  %v276_v23 = vmul.f32 %v274_v36, %v268_v17  ;;  %v305_v30 = vmul.f32 %v304_v39, %v267_v34  ;;  %v306_v33 = vmul.f32 %v304_v39, %v268_v17 }
  0xae   :  { %v285_v4 = vmul.f32 %v284_v37, %v267_v34  ;;  %v286_v5 = vmul.f32 %v284_v37, %v268_v17  ;;  %v295_v63 = vmul.f32 %v294_v38, %v267_v34  ;;  %v296_v36 = vmul.f32 %v294_v38, %v268_v17 }
  0xaf   :  { %v307_v62 = vadd.f32 %v305_v30, %v300_v32  ;;  %v308_v42 = vadd.f32 %v306_v33, %v301_v25  ;;  %v315_v41 = vmul.f32 %v314_v40, %v267_v34  ;;  %v316_v39 = vmul.f32 %v314_v40, %v268_v17 }
  0xb0   :  { %v325_v1 = vmul.f32 %v2467_v13, %v267_v34  ;;  %v326_v37 = vmul.f32 %v2468_v0, %v268_v17  ;;  %v277_v47 = vadd.f32 %v275_v18, %v270_v2  ;;  %v278_v8 = vadd.f32 %v276_v23, %v271_v9 }
  0xb1   :  { %v335_v59 = vmul.f32 %v2469_v7, %v267_v34  ;;  %v336_v16 = vmul.f32 %v2470_v35, %v268_v17  ;;  %v287_v38 = vadd.f32 %v285_v4, %v280_v10  ;;  %v288_v25 = vadd.f32 %v286_v5, %v281_v22  ;;  %v1630_v7 = vpop.permute.xlu2 %441 }
  0xb2   :  { %v353_v19 = vpop.permute.xlu1 %352  ;;  %v437_v40 = vsel %vm428_vm9, %v436_v3, 0.0  ;;  %v438_v0 = vsel %vm429_vm10, %v435_v6, 0.0  ;;  %v297_v32 = vadd.f32 %v295_v63, %v290_v26  ;;  %v298_v2 = vadd.f32 %v296_v36, %v291_v31 }
  0xb3   :  { %v351_v13 = vpop.permute.xlu0 %350  ;;  %v317_v4 = vadd.f32 %v315_v41, %v310_v27  ;;  %v318_v5 = vadd.f32 %v316_v39, %v311_v28  ;;  %v327_v22 = vadd.f32 %v325_v1, %v320_v24  ;;  %v328_v3 = vadd.f32 %v326_v37, %v321_v29 }
  0xb4   :  { %v337_v9 = vadd.f32 %v335_v59, %v330_v21  ;;  %v338_v6 = vadd.f32 %v336_v16, %v331_v11  ;;  %v2473_v10 = vstv %s1399_s17  ;;  %v2475_v63 = vstv %s1401_s18  ;;  %s1893_s17 = sld [smem:[#allocation4 + $0x35]] }
  0xb5   :  { %v1634_v34 = vmul.f32 %v2473_v10, %v437_v40  ;;  %v2474_v17 = vmov %v2473_v10  ;;  %v1642_v26 = vmul.f32 %v2475_v63, %v437_v40  ;;  %v2476_v31 = vmov %v2475_v63  ;;  %s1907_s18 = sld [smem:[#allocation4 + $0x5]] }
  0xb6   :  { %v1638_v35 = vmul.f32 %v2474_v17, %v438_v0  ;;  %v1646_v41 = vmul.f32 %v2476_v31, %v438_v0  ;;  %v2477_v27 = vstv %s1406_s19  ;;  %v2479_v59 = vstv %s1408_s0  ;;  %s1917_s19 = sld [smem:[#allocation4 + $0x11]] }
  0xb7   :  { %v1650_v28 = vmul.f32 %v2477_v27, %v437_v40  ;;  %v2478_v1 = vmov %v2477_v27  ;;  %v1658_v11 = vmul.f32 %v2479_v59, %v437_v40  ;;  %v2480_v21 = vmov %v2479_v59  ;;  %s1927_s0 = sld [smem:[#allocation4 + $0x42]] }
  0xb8   :  { %v1654_v24 = vmul.f32 %v2478_v1, %v438_v0  ;;  %v1662_v29 = vmul.f32 %v2480_v21, %v438_v0  ;;  %v2481_v18 = vstv %s2471_s6  ;;  %v2483_v36 = vstv %s2472_s7  ;;  %s1291_s6 = smov 48   ;;  %s2114_s7 = sld [smem:[#allocation4 + $0x26]] }
  0xb9   :  { %v1666_v23 = vmul.f32 %v2481_v18, %v437_v40  ;;  %v2482_v30 = vmov %v2481_v18  ;;  %v1674_v39 = vmul.f32 %v2483_v36, %v437_v40  ;;  %v2484_v37 = vmov %v2483_v36 }
  0xba   :  { %v1670_v33 = vmul.f32 %v2482_v30, %v438_v0  ;;  %v1678_v16 = vmul.f32 %v2484_v37, %v438_v0  ;;  %v2485_v10 = vstv %s1420_s21  ;;  %v391_v27 = vadd.f32 %v1491_v51, %v307_v62  ;;  %s1952_s21 = sld [smem:[#allocation4 + $0x37]] }
  0xbb   :  { %v1682_v17 = vmul.f32 %v2485_v10, %v437_v40  ;;  %v2486_v63 = vmov %v2485_v10  ;;  %v392_v1 = vadd.f32 %v1493_v52, %v308_v42  ;;  %v361_v59 = vadd.f32 %v1477_v43, %v277_v47  ;;  %v440_v40 = vpop.permute.xlu1 %439 }
  0xbc   :  { %v1686_v31 = vmul.f32 %v2486_v63, %v438_v0  ;;  %v362_v21 = vadd.f32 %v1479_v44, %v278_v8  ;;  %v371_v18 = vadd.f32 %v1481_v45, %v287_v38  ;;  %v372_v30 = vadd.f32 %v1483_v46, %v288_v25  ;;  %v1706_v46 = vpop.permute.xlu0 %729  ;;  %v1714_v38 = vpop.permute.xlu2 %738 }
  0xbd   :  { %v381_v0 = vadd.f32 %v1487_v49, %v297_v32  ;;  %v382_v51 = vadd.f32 %v1489_v50, %v298_v2  ;;  %v354_v47 = vsel %vm345_vm2, %v351_v13, %v353_v19  ;;  %v355_v8 = vsel %vm345_vm2, %v353_v19, %v351_v13 }
  0xbe   :  { %v401_v42 = vadd.f32 %v1495_v53, %v317_v4  ;;  %v402_v43 = vadd.f32 %v1497_v54, %v318_v5  ;;  %v356_v44 = vsel %vm339_vm3, %v355_v8, 0.0  ;;  %v357_v45 = vsel %vm340_vm4, %v354_v47, 0.0 }
  0xbf   :  { %v411_v49 = vadd.f32 %v1499_v55, %v327_v22  ;;  %v412_v50 = vadd.f32 %v1501_v56, %v328_v3  ;;  %v2487_v52 = vstv %s2462_s16  ;;  %v2489_v54 = vstv %s1425_s23  ;;  %s1887_s16 = sld [smem:[#allocation4 + $0x34]] }
  0xc0   :  { %v364_v62 = vmul.f32 %v2487_v52, %v356_v44  ;;  %v2488_v19 = vmov %v2487_v52  ;;  %v374_v25 = vmul.f32 %v2489_v54, %v356_v44  ;;  %v2490_v13 = vmov %v2489_v54  ;;  %s1970_s23 = sld [smem:[#allocation4 + $0x13]] }
  0xc1   :  { %v365_v53 = vmul.f32 %v2488_v19, %v357_v45  ;;  %v375_v32 = vmul.f32 %v2490_v13, %v357_v45  ;;  %v2491_v2 = vstv %s1435_s22  ;;  %v421_v55 = vadd.f32 %v1503_v58, %v337_v9  ;;  %s1961_s22 = sld [smem:[#allocation4 + $0x43]] }
  0xc2   :  { %v394_v4 = vmul.f32 %v2491_v2, %v356_v44  ;;  %v2492_v5 = vmov %v2491_v2  ;;  %v422_v56 = vadd.f32 %v1505_v61, %v338_v6  ;;  %v2493_v22 = vstv %s1429_s2  ;;  %s1770_s2 = sld [smem:[#allocation4 + $0x4]] }
  0xc3   :  { %v395_v36 = vmul.f32 %v2492_v5, %v357_v45  ;;  %v384_v3 = vmul.f32 %v2493_v22, %v356_v44  ;;  %v2494_v37 = vmov %v2493_v22  ;;  %v610_v8 = vmul.f32 %v1567_v20, %v1329_v48 }
  0xc4   :  { %v385_v10 = vmul.f32 %v2494_v37, %v357_v45  ;;  %v396_v63 = vadd.f32 %v394_v4, %v391_v27  ;;  %v611_v52 = vmul.f32 %v1567_v20, %v1336_v60  ;;  %v366_v19 = vadd.f32 %v364_v62, %v361_v59 }
  0xc5   :  { %v397_v47 = vadd.f32 %v395_v36, %v392_v1  ;;  %v367_v54 = vadd.f32 %v365_v53, %v362_v21  ;;  %v2495_v13 = vstv %s1443_s24  ;;  %v376_v6 = vadd.f32 %v374_v25, %v371_v18  ;;  %v1742_v1 = vpop.permute.xlu1 %731  ;;  %v2501_v18 = vld [vmem:[#allocation28_spill] sm:$0xff]  ;;  %s1980_s24 = sld [smem:[#allocation4 + $0x44]] }
  0xc6   :  { %v404_v58 = vmul.f32 %v2495_v13, %v356_v44  ;;  %v2496_v9 = vmov %v2495_v13  ;;  %v377_v2 = vadd.f32 %v375_v32, %v372_v30  ;;  %v2497_v5 = vstv %s1449_s25  ;;  %s1989_s25 = sld [smem:[#allocation4 + $0x14]] }
  0xc7   :  { %v405_v61 = vmul.f32 %v2496_v9, %v357_v45  ;;  %v414_v22 = vmul.f32 %v2497_v5, %v356_v44  ;;  %v2498_v37 = vmov %v2497_v5  ;;  %v386_v4 = vadd.f32 %v384_v3, %v381_v0 }
  0xc8   :  { %v415_v27 = vmul.f32 %v2498_v37, %v357_v45  ;;  %v387_v36 = vadd.f32 %v385_v10, %v382_v51  ;;  %v2499_v48 = vstv %s1455_s26  ;;  %v1750_v62 = vsel %vm239_vm1, %v610_v8, %v1588_v57  ;;  %s1998_s26 = sld [smem:[#allocation4 + $0x45]] }
  0xc9   :  { %v424_v20 = vmul.f32 %v2499_v48, %v356_v44  ;;  %v2500_v59 = vmov %v2499_v48  ;;  %v1754_v30 = vsel %vm239_vm1, %v611_v52, %v2501_v18  ;;  %v443_v53 = vsel %vm434_vm8, %v440_v40, %v1630_v7  ;;  %v1772_v52 = vpop.permute.xlu0 %740 }
  0xca   :  { %v425_v21 = vmul.f32 %v2500_v59, %v357_v45  ;;  %v444_v0 = vsel %vm434_vm8, %v1630_v7, %v440_v40  ;;  %v406_v51 = vadd.f32 %v404_v58, %v401_v42  ;;  %v407_v48 = vadd.f32 %v405_v61, %v402_v43 }
  0xcb   :  { %v445_v44 = vsel %vm428_vm9, %v444_v0, 0.0  ;;  %v446_v57 = vsel %vm429_vm10, %v443_v53, 0.0  ;;  %v416_v45 = vadd.f32 %v414_v22, %v411_v49  ;;  %v417_v25 = vadd.f32 %v415_v27, %v412_v50  ;;  %v1778_v49 = vpop.permute.xlu2 %820 }
  0xcc   :  { %v2502_v32 = vstv %s1463_s27  ;;  %v426_v7 = vadd.f32 %v424_v20, %v421_v55  ;;  %v427_v40 = vadd.f32 %v425_v21, %v422_v56  ;;  %v450_v42 = vadd.f32 %v1634_v34, %v366_v19  ;;  %s2027_s27 = sld [smem:[#allocation4 + $0xa]] }
  0xcd   :  { %v453_v3 = vmul.f32 %v2502_v32, %v445_v44  ;;  %v2503_v10 = vmov %v2502_v32  ;;  %v451_v43 = vadd.f32 %v1638_v35, %v367_v54  ;;  %v460_v50 = vadd.f32 %v1642_v26, %v376_v6 }
  0xce   :  { %v454_v8 = vmul.f32 %v2503_v10, %v446_v57  ;;  %v461_v13 = vadd.f32 %v1646_v41, %v377_v2  ;;  %v2504_v58 = vstv %s1469_s28  ;;  %v470_v34 = vadd.f32 %v1650_v28, %v386_v4  ;;  %v1804_v28 = vpop.permute.xlu1 %818  ;;  %s2039_s28 = sld [smem:[#allocation4 + $0x3b]] }
  0xcf   :  { %v463_v9 = vmul.f32 %v2504_v58, %v445_v44  ;;  %v2505_v55 = vmov %v2504_v58  ;;  %v471_v35 = vadd.f32 %v1654_v24, %v387_v36  ;;  %v480_v19 = vadd.f32 %v1658_v11, %v396_v63 }
  0xd0   :  { %v464_v56 = vmul.f32 %v2505_v55, %v446_v57  ;;  %v481_v26 = vadd.f32 %v1662_v29, %v397_v47  ;;  %v1794_v41 = vadd.f32 %v453_v3, %v450_v42  ;;  %v1796_v54 = vadd.f32 %v454_v8, %v451_v43 }
  0xd1   :  { %v2506_v61 = vstv %s1485_s30  ;;  %v2508_v24 = vstv %s1475_s29  ;;  %v2510_v47 = vstv %s1515_s14  ;;  %v1816_v4 = vadd.f32 %v463_v9, %v460_v50  ;;  %s1828_s14 = sld [smem:[#allocation4 + $0x4a]] }
  0xd2   :  { %v483_v6 = vmul.f32 %v2506_v61, %v445_v44  ;;  %v2507_v2 = vmov %v2506_v61  ;;  %v473_v11 = vmul.f32 %v2508_v24, %v445_v44  ;;  %v2509_v63 = vmov %v2508_v24  ;;  %s2051_s29 = sld [smem:[#allocation4 + $0x3c]] }
  0xd3   :  { %v484_v5 = vmul.f32 %v2507_v2, %v446_v57  ;;  %v474_v29 = vmul.f32 %v2509_v63, %v446_v57  ;;  %v493_v22 = vmul.f32 %v2510_v47, %v445_v44  ;;  %v2511_v37 = vmov %v2510_v47  ;;  %s2056_s30 = sld [smem:[#allocation4 + $0xc]] }
  0xd4   :  { %v494_v27 = vmul.f32 %v2511_v37, %v446_v57  ;;  %v1818_v36 = vadd.f32 %v464_v56, %v461_v13  ;;  %v485_v20 = vadd.f32 %v483_v6, %v480_v19  ;;  %v490_v21 = vadd.f32 %v1666_v23, %v406_v51 }
  0xd5   :  { %v486_v59 = vadd.f32 %v484_v5, %v481_v26  ;;  %v491_v18 = vadd.f32 %v1670_v33, %v407_v48  ;;  %v2512_v53 = vstv %s1524_s20  ;;  %v500_v10 = vadd.f32 %v1674_v39, %v416_v45  ;;  %v1856_v45 = vpop.permute.xlu2 %907  ;;  %s1944_s20 = sld [smem:[#allocation4 + $0x36]] }
  0xd6   :  { %v503_v0 = vmul.f32 %v2512_v53, %v445_v44  ;;  %v2513_v32 = vmov %v2512_v53  ;;  %v501_v8 = vadd.f32 %v1678_v16, %v417_v25  ;;  %v2514_v42 = vstv %s1532_s1  ;;  %s1935_s1 = sld [smem:[#allocation4 + $0x6]] }
  0xd7   :  { %v504_v3 = vmul.f32 %v2513_v32, %v446_v57  ;;  %v513_v43 = vmul.f32 %v2514_v42, %v445_v44  ;;  %v2515_v50 = vmov %v2514_v42  ;;  %v1836_v58 = vadd.f32 %v473_v11, %v470_v34  ;;  %v828_v44 = vpop.permute.xlu0 %827 }
  0xd8   :  { %v514_v13 = vmul.f32 %v2515_v50, %v446_v57  ;;  %v1838_v9 = vadd.f32 %v474_v29, %v471_v35  ;;  %v1840_v23 = vadd.f32 %v493_v22, %v490_v21  ;;  %v1842_v33 = vadd.f32 %v494_v27, %v491_v18 }
  0xd9   :  { %v1844_v51 = vadd.f32 %v503_v0, %v500_v10  ;;  %v1846_v48 = vadd.f32 %v504_v3, %v501_v8  ;;  %v510_v39 = vadd.f32 %v1682_v17, %v426_v7  ;;  %v511_v16 = vadd.f32 %v1686_v31, %v427_v40  ;;  %v830_v7 = vpop.permute.xlu1 %829 }
  0xda   :  { %v1851_v57 = vadd.f32 %v1750_v62, %v485_v20  ;;  %v1863_v31 = vadd.f32 %v1754_v30, %v486_v59  ;;  %v746_v62 = vstv %s1770_s2  ;;  %v756_v40 = vstv %s1776_s8  ;;  %s2119_s2 = sld [smem:[#allocation4 + $0x57]]  ;;  %s1292_s8 = smov 16  }
  0xdb   :  { %2516 = vst [vmem:[#allocation28_spill] sm:$0xff] %v1846_v48  ;;  %v1858_v25 = vadd.f32 %v513_v43, %v510_v39  ;;  %v1860_v17 = vadd.f32 %v514_v13, %v511_v16  ;;  %v734_v55 = vsel %vm733_vm13, %v1706_v46, %v1742_v1  ;;  %v735_v56 = vsel %vm733_vm13, %v1742_v1, %v1706_v46 }
  0xdc   :  { %2517 = vst [vmem:[#allocation29_spill] sm:$0xff] %v1851_v57  ;;  %v742_v30 = vsel %vm733_vm13, %v1714_v38, %v1772_v52  ;;  %v766_v34 = vstv %s1786_s9  ;;  %v776_v35 = vstv %s1792_s10  ;;  %v736_v19 = vsel %vm727_vm11, %v734_v55, 0.0  ;;  %s2130_s9 = sld [smem:[#allocation4 + $0x58]] }
  0xdd   :  { %2518 = vst [vmem:[#allocation30_spill] sm:$0xff] %v1863_v31  ;;  %v737_v26 = vsel %vm728_vm12, %v735_v56, 0.0  ;;  %v786_v61 = vstv %s1802_s11  ;;  %v796_v6 = vstv %s1814_s12  ;;  %v806_v46 = vstv %s1820_s13  ;;  %v919_v43 = vpop.permute.xlu2 %918  ;;  %s2136_s10 = sld [smem:[#allocation4 + $0x28]] }
  0xde   :  { %v1895_v2 = vmul.f32 %v746_v62, %v736_v19  ;;  %v1897_v5 = vmul.f32 %v746_v62, %v737_v26  ;;  %v743_v24 = vsel %vm733_vm13, %v1772_v52, %v1714_v38  ;;  %v1905_v11 = vsel %vm727_vm11, %v742_v30, 0.0  ;;  %s2142_s11 = sld [smem:[#allocation4 + $0x1f]] }
  0xdf   :  { %v1909_v63 = vmul.f32 %v756_v40, %v736_v19  ;;  %v1911_v29 = vmul.f32 %v756_v40, %v737_v26  ;;  %v1913_v47 = vmul.f32 %v766_v34, %v736_v19  ;;  %v1915_v22 = vmul.f32 %v766_v34, %v737_v26  ;;  %v910_v0 = vpop.permute.xlu0 %909  ;;  %s2148_s12 = sld [smem:[#allocation4 + $0x50]] }
  0xe0   :  { %v1919_v37 = vmul.f32 %v776_v35, %v736_v19  ;;  %v1921_v27 = vmul.f32 %v776_v35, %v737_v26  ;;  %v1923_v38 = vmul.f32 %v786_v61, %v736_v19  ;;  %v1925_v52 = vmul.f32 %v786_v61, %v737_v26  ;;  %v2523_v35 = vld [vmem:[#allocation18_spill] sm:$0xff]  ;;  %s2153_s13 = sld [smem:[#allocation4 + $0x59]] }
  0xe1   :  { %v1929_v20 = vmul.f32 %v796_v6, %v736_v19  ;;  %v1931_v59 = vmul.f32 %v796_v6, %v737_v26  ;;  %v1937_v21 = vmul.f32 %v806_v46, %v736_v19  ;;  %v823_v18 = vsel %vm822_vm15, %v1804_v28, %v1778_v49  ;;  %v917_v42 = vpop.permute.xlu1 %916 }
  0xe2   :  { %2519 = vst [vmem:[#allocation31_spill] sm:$0xff] %v1919_v37  ;;  %v824_v53 = vsel %vm822_vm15, %v1778_v49, %v1804_v28  ;;  %v1946_v32 = vmul.f32 %v806_v46, %v737_v26  ;;  %v1950_v3 = vsel %vm728_vm12, %v743_v24, 0.0  ;;  %v831_v10 = vsel %vm822_vm15, %v828_v44, %v830_v7  ;;  %v2524_v26 = vld [vmem:[#allocation19_spill] sm:$0xff] }
  0xe3   :  { %2520 = vst [vmem:[#allocation32_spill] sm:$0xff] %v1921_v27  ;;  %v832_v8 = vsel %vm822_vm15, %v830_v7, %v828_v44  ;;  %v1956_v50 = vsel %vm816_vm14, %v823_v18, 0.0  ;;  %vm905_vm2 = vcmp.lt.s32.totalorder %v1415_v14, 13  ;;  %vm911_vm3 = vcmp.lt.s32.totalorder %v1393_v12, 125 }
  0xe4   :  { %2521 = vst [vmem:[#allocation33_spill] sm:$0xff] %v1931_v59  ;;  %v517_v49 = vstv %s1879_s15  ;;  %v1965_v28 = vsel %vm817_vm0, %v824_v53, 0.0  ;;  %vm906_vm4 = vcmp.lt.s32.totalorder %v1418_v15, 13  ;;  %v912_v13 = vsel %vm911_vm3, %v1856_v45, %v910_v0  ;;  %s2162_s15 = sld [smem:[#allocation4 + $0x29]] }
  0xe5   :  { %v913_v39 = vsel %vm911_vm3, %v910_v0, %v1856_v45  ;;  %v1974_v16 = vsel %vm816_vm14, %v831_v10, 0.0  ;;  %v1978_v44 = vsel %vm817_vm0, %v832_v8, 0.0  ;;  %v920_v62 = vsel %vm911_vm3, %v917_v42, %v919_v43  ;;  %v2522_v45 = vld [vmem:[#allocation15_spill] sm:$0xff] }
  0xe6   :  { %v921_v7 = vsel %vm911_vm3, %v919_v43, %v917_v42  ;;  %v1984_v40 = vsel %vm905_vm2, %v912_v13, 0.0  ;;  %v519_v55 = vmul.f32 %v517_v49, %v2522_v45  ;;  %v521_v56 = vmul.f32 %v517_v49, %v1336_v60 }
  0xe7   :  { %v532_v30 = vstv %s1887_s16  ;;  %v1993_v34 = vsel %vm906_vm4, %v913_v39, 0.0  ;;  %v751_v6 = vstv %s1893_s17  ;;  %v2002_v46 = vsel %vm905_vm2, %v920_v62, 0.0  ;;  %s2170_s16 = sld [smem:[#allocation4 + $0x5a]] }
  0xe8   :  { %v534_v19 = vmul.f32 %v532_v30, %v2523_v35  ;;  %v536_v61 = vmul.f32 %v532_v30, %v2524_v26  ;;  %v2006_v24 = vsel %vm906_vm4, %v921_v7, 0.0  ;;  %v527_v18 = vsel %vm239_vm1, %v521_v56, %v519_v55  ;;  %v2525_v7 = vld [vmem:[#allocation13_spill] sm:$0xff]  ;;  %v2526_v55 = vld [vmem:[#allocation14_spill] sm:$0xff]  ;;  %s2181_s17 = sld [smem:[#allocation4 + $0x51]] }
  0xe9   :  { %v835_v53 = vstv %s1907_s18  ;;  %v531_v0 = vadd.f32 %v527_v18, %v1796_v54  ;;  %v2440_v8 = vstv %s1944_s20  ;;  %v2441_v42 = vstv %s1935_s1  ;;  %v2527_v18 = vld [vmem:[#allocation16_spill] sm:$0xff]  ;;  %s1293_s18 = smov 32  }
  0xea   :  { %v542_v10 = vsel %vm239_vm1, %v536_v61, %v534_v19  ;;  %v753_v14 = vmul.f32 %v751_v6, %v1950_v3  ;;  %v2017_v13 = vstv %s1917_s19  ;;  %v2020_v15 = vstv %s1927_s0  ;;  %s2195_s19 = sld [smem:[#allocation4 + $0x21]] }
  0xeb   :  { %v546_v39 = vadd.f32 %v542_v10, %v531_v0  ;;  %v837_v62 = vmul.f32 %v835_v53, %v1965_v28  ;;  %v578_v54 = vmul.f32 %v2017_v13, %v2525_v7  ;;  %v580_v56 = vmul.f32 %v2017_v13, %v2526_v55  ;;  %v2528_v10 = vld [vmem:[#allocation17_spill] sm:$0xff]  ;;  %s2206_s0 = sld [smem:[#allocation4 + $0x52]] }
  0xec   :  { %v842_v19 = vmul.f32 %v2440_v8, %v1978_v44  ;;  %v926_v61 = vmul.f32 %v2441_v42, %v1993_v34  ;;  %v593_v0 = vmul.f32 %v2020_v15, %v2527_v18  ;;  %v595_v1 = vmul.f32 %v2020_v15, %v2528_v10 }
  0xed   :  { %v750_v43 = vadd.f32 %v1897_v5, %v546_v39  ;;  %v2529_v12 = vstv %s1952_s21  ;;  %v586_v8 = vsel %vm239_vm1, %v580_v56, %v578_v54  ;;  %v771_v37 = vstv %s1961_s22  ;;  %s2233_s22 = sld [smem:[#allocation4 + $0x5e]] }
  0xee   :  { %v931_v27 = vmul.f32 %v2529_v12, %v2006_v24  ;;  %v590_v42 = vadd.f32 %v586_v8, %v1836_v58  ;;  %v601_v31 = vsel %vm239_vm1, %v595_v1, %v593_v0  ;;  %v2443_v57 = vstv %s1970_s23 }
  0xef   :  { %v2442_v59 = vstv %s1980_s24  ;;  %v755_v48 = vadd.f32 %v753_v14, %v750_v43  ;;  %v2445_v5 = vstv %s1989_s25  ;;  %v2444_v39 = vstv %s1998_s26 }
  0xf0   :  { %v518_v12 = vmul.f32 %v517_v49, %v2525_v7  ;;  %v605_v54 = vadd.f32 %v601_v31, %v590_v42  ;;  %v772_v58 = vmul.f32 %v771_v37, %v1905_v11  ;;  %v520_v8 = vmul.f32 %v517_v49, %v2526_v55 }
  0xf1   :  { %v533_v1 = vmul.f32 %v532_v30, %v2527_v18  ;;  %v839_v56 = vadd.f32 %v837_v62, %v755_v48  ;;  %v856_v0 = vmul.f32 %v2443_v57, %v1956_v50  ;;  %v861_v14 = vmul.f32 %v2442_v59, %v1974_v16 }
  0xf2   :  { %v535_v43 = vmul.f32 %v532_v30, %v2528_v10  ;;  %v769_v31 = vadd.f32 %v1913_v47, %v605_v54  ;;  %v945_v49 = vmul.f32 %v2445_v5, %v1984_v40  ;;  %v950_v48 = vmul.f32 %v2444_v39, %v2002_v46 }
  0xf3   :  { %v526_v42 = vsel %vm239_vm1, %v520_v8, %v518_v12  ;;  %v844_v62 = vadd.f32 %v842_v19, %v839_v56  ;;  %v752_v57 = vmul.f32 %v751_v6, %v1905_v11  ;;  %v836_v54 = vmul.f32 %v835_v53, %v1956_v50 }
  0xf4   :  { %v530_v59 = vadd.f32 %v526_v42, %v1794_v41  ;;  %v541_v30 = vsel %vm239_vm1, %v535_v43, %v533_v1  ;;  %v774_v47 = vadd.f32 %v772_v58, %v769_v31  ;;  %v547_v39 = vstv %s2027_s27  ;;  %s1294_s27 = smov 96  }
  0xf5   :  { %v562_v5 = vstv %s2039_s28  ;;  %v928_v12 = vadd.f32 %v926_v61, %v844_v62  ;;  %v549_v19 = vmul.f32 %v547_v39, %v2522_v45  ;;  %v551_v56 = vmul.f32 %v547_v39, %v1336_v60  ;;  %s2280_s28 = sld [smem:[#allocation4 + $0x61]] }
  0xf6   :  { %v545_v8 = vadd.f32 %v541_v30, %v530_v59  ;;  %v858_v41 = vadd.f32 %v856_v0, %v774_v47  ;;  %v564_v1 = vmul.f32 %v562_v5, %v2523_v35  ;;  %v566_v6 = vmul.f32 %v562_v5, %v2524_v26 }
  0xf7   :  { %v761_v43 = vstv %s2051_s29  ;;  %v933_v42 = vadd.f32 %v931_v27, %v928_v12  ;;  %v557_v58 = vsel %vm239_vm1, %v551_v56, %v549_v19  ;;  %v845_v61 = vstv %s2056_s30  ;;  %s2299_s29 = sld [smem:[#allocation4 + $0x49]]  ;;  %s1295_s30 = smov 112  }
  0xf8   :  { %v749_v53 = vadd.f32 %v1895_v2, %v545_v8  ;;  %v863_v59 = vadd.f32 %v861_v14, %v858_v41  ;;  %v2530_v31 = vstv %s1944_s20  ;;  %v561_v0 = vadd.f32 %v557_v58, %v1818_v36  ;;  %s2218_s20 = sld [smem:[#allocation4 + $0x53]] }
  0xf9   :  { %v841_v62 = vmul.f32 %v2530_v31, %v1974_v16  ;;  %v572_v30 = vsel %vm239_vm1, %v566_v6, %v564_v1  ;;  %998 = vrot.lane.b32.xlu1 %v933_v42, %s1291_s6  ;;  %v2531_v47 = vstv %s1935_s1  ;;  %v763_v12 = vmul.f32 %v761_v43, %v1950_v3  ;;  %s2212_s1 = sld [smem:[#allocation4 + $0x22]] }
  0xfa   :  { %v754_v27 = vadd.f32 %v752_v57, %v749_v53  ;;  %v925_v2 = vmul.f32 %v2531_v47, %v1984_v40  ;;  %v847_v8 = vmul.f32 %v845_v61, %v1965_v28  ;;  %v947_v14 = vadd.f32 %v945_v49, %v863_v59 }
  0xfb   :  { %v576_v19 = vadd.f32 %v572_v30, %v561_v0  ;;  %v850_v56 = vstv %s2070_s3  ;;  %v934_v41 = vstv %s2080_s4  ;;  %v939_v36 = vstv %s2085_s5  ;;  %s2311_s3 = sld [smem:[#allocation4 + $0x1a]] }
  0xfc   :  { %v838_v31 = vadd.f32 %v836_v54, %v754_v27  ;;  %v548_v1 = vmul.f32 %v547_v39, %v2525_v7  ;;  %v550_v6 = vmul.f32 %v547_v39, %v2526_v55  ;;  %v952_v57 = vadd.f32 %v950_v48, %v947_v14  ;;  %s2325_s4 = sld [smem:[#allocation4 + $0x4b]] }
  0xfd   :  { %v760_v42 = vadd.f32 %v1911_v29, %v576_v19  ;;  %v563_v53 = vmul.f32 %v562_v5, %v2527_v18  ;;  %v565_v58 = vmul.f32 %v562_v5, %v2528_v10  ;;  %v2532_v59 = vstv %s1952_s21  ;;  %s2225_s21 = sld [smem:[#allocation4 + $0x2d]] }
  0xfe   :  { %v843_v49 = vadd.f32 %v841_v62, %v838_v31  ;;  %v930_v54 = vmul.f32 %v2532_v59, %v2002_v46  ;;  %v852_v0 = vmul.f32 %v850_v56, %v1978_v44  ;;  %v556_v30 = vsel %vm239_vm1, %v550_v6, %v548_v1  ;;  %1022 = vrot.lane.b32.xlu2 %v952_v57, %s1292_s8  ;;  %s2335_s5 = sld [smem:[#allocation4 + $0x1b]] }
  0xff   :  { %v765_v39 = vadd.f32 %v763_v12, %v760_v42  ;;  %v936_v29 = vmul.f32 %v934_v41, %v1993_v34  ;;  %v560_v48 = vadd.f32 %v556_v30, %v1816_v4  ;;  %v571_v5 = vsel %vm239_vm1, %v565_v58, %v563_v53 }
 0x100   :  { %v927_v62 = vadd.f32 %v925_v2, %v843_v49  ;;  %v941_v27 = vmul.f32 %v939_v36, %v2006_v24  ;;  %v762_v47 = vmul.f32 %v761_v43, %v1905_v11  ;;  %v579_v14 = vmul.f32 %v2017_v13, %v2522_v45 }
 0x101   :  { %v849_v19 = vadd.f32 %v847_v8, %v765_v39  ;;  %v575_v12 = vadd.f32 %v571_v5, %v560_v48  ;;  %v581_v31 = vmul.f32 %v2017_v13, %v1336_v60  ;;  %v594_v4 = vmul.f32 %v2020_v15, %v2523_v35 }
 0x102   :  { %v932_v2 = vadd.f32 %v930_v54, %v927_v62  ;;  %v846_v1 = vmul.f32 %v845_v61, %v1956_v50  ;;  %v851_v43 = vmul.f32 %v850_v56, %v1974_v16  ;;  %v596_v6 = vmul.f32 %v2020_v15, %v2524_v26 }
 0x103   :  { %v854_v8 = vadd.f32 %v852_v0, %v849_v19  ;;  %v759_v13 = vadd.f32 %v1909_v63, %v575_v12  ;;  %v935_v57 = vmul.f32 %v934_v41, %v1984_v40  ;;  %v587_v42 = vsel %vm239_vm1, %v581_v31, %v579_v14 }
 0x104   :  { %996 = vrot.lane.b32.xlu0 %v932_v2, %s1291_s6  ;;  %v940_v61 = vmul.f32 %v939_v36, %v2002_v46  ;;  %v591_v56 = vadd.f32 %v587_v42, %v1838_v9  ;;  %v602_v15 = vsel %vm239_vm1, %v596_v6, %v594_v4  ;;  %v773_v53 = vmul.f32 %v771_v37, %v1950_v3  ;;  %s2342_s6 = sld [smem:[#allocation4 + $0x4c]] }
 0x105   :  { %v938_v63 = vadd.f32 %v936_v29, %v854_v8  ;;  %v764_v41 = vadd.f32 %v762_v47, %v759_v13  ;;  %v2165_v58 = vstv %s2114_s7  ;;  %v2168_v49 = vstv %s2119_s2  ;;  %s1296_s7 = smov 80  }
 0x106   :  { %v606_v59 = vadd.f32 %v602_v15, %v591_v56  ;;  %v668_v9 = vmul.f32 %v2165_v58, %v2525_v7  ;;  %v670_v37 = vmul.f32 %v2165_v58, %v2526_v55  ;;  %v683_v36 = vmul.f32 %v2168_v49, %v2527_v18 }
 0x107   :  { %v943_v54 = vadd.f32 %v941_v27, %v938_v63  ;;  %v848_v0 = vadd.f32 %v846_v1, %v764_v41  ;;  %v685_v30 = vmul.f32 %v2168_v49, %v2528_v10  ;;  %v801_v39 = vstv %s2130_s9 }
 0x108   :  { %v770_v29 = vadd.f32 %v1915_v22, %v606_v59  ;;  %v2533_v48 = vstv %s1970_s23  ;;  %v676_v62 = vsel %vm239_vm1, %v670_v37, %v668_v9  ;;  %v885_v47 = vstv %s2136_s10  ;;  %s2249_s23 = sld [smem:[#allocation4 + $0x5f]] }
 0x109   :  { %v857_v5 = vmul.f32 %v2533_v48, %v1965_v28  ;;  %1011 = vrot.lane.b32.xlu2 %v943_v54, %s1293_s18  ;;  %v853_v27 = vadd.f32 %v851_v43, %v848_v0  ;;  %v2534_v14 = vstv %s1980_s24  ;;  %v680_v12 = vadd.f32 %v676_v62, %v1844_v51  ;;  %s2256_s24 = sld [smem:[#allocation4 + $0x2f]] }
 0x10a   :  { %v862_v19 = vmul.f32 %v2534_v14, %v1978_v44  ;;  %v691_v22 = vsel %vm239_vm1, %v685_v30, %v683_v36  ;;  %v775_v31 = vadd.f32 %v773_v53, %v770_v29  ;;  %v2535_v4 = vstv %s1989_s25  ;;  %s2263_s25 = sld [smem:[#allocation4 + $0x60]] }
 0x10b   :  { %v946_v2 = vmul.f32 %v2535_v4, %v1993_v34  ;;  %v2536_v1 = vstv %s1998_s26  ;;  %v802_v43 = vmul.f32 %v801_v39, %v1905_v11  ;;  %v937_v8 = vadd.f32 %v935_v57, %v853_v27  ;;  %s2268_s26 = sld [smem:[#allocation4 + $0x30]] }
 0x10c   :  { %v951_v6 = vmul.f32 %v2536_v1, %v2006_v24  ;;  %v695_v51 = vadd.f32 %v691_v22, %v680_v12  ;;  %v886_v13 = vmul.f32 %v885_v47, %v1956_v50  ;;  %v890_v42 = vstv %s2153_s13  ;;  %s2547_s10 = sld [smem:[#allocation34_spill]] }
 0x10d   :  { %v859_v56 = vadd.f32 %v857_v5, %v775_v31  ;;  %v974_v15 = vstv %s2162_s15  ;;  %v637_v53 = vstv %s2142_s11  ;;  %v652_v63 = vstv %s2148_s12 }
 0x10e   :  { %v942_v41 = vadd.f32 %v940_v61, %v937_v8  ;;  %v799_v59 = vadd.f32 %v1929_v20, %v695_v51  ;;  %v639_v57 = vmul.f32 %v637_v53, %v2522_v45  ;;  %v641_v9 = vmul.f32 %v637_v53, %v1336_v60 }
 0x10f   :  { %v864_v37 = vadd.f32 %v862_v19, %v859_v56  ;;  %v979_v36 = vstv %s2170_s16  ;;  %v654_v54 = vmul.f32 %v652_v63, %v2523_v35  ;;  %v656_v0 = vmul.f32 %v652_v63, %v2524_v26 }
 0x110   :  { %1009 = vrot.lane.b32.xlu1 %v942_v41, %s1293_s18  ;;  %v804_v20 = vadd.f32 %v802_v43, %v799_v59  ;;  %v891_v61 = vmul.f32 %v890_v42, %v1974_v16  ;;  %v647_v30 = vsel %vm239_vm1, %v641_v9, %v639_v57  ;;  %v791_v29 = vstv %s2181_s17 }
 0x111   :  { %v2537_v48 = vstv %s1828_s14  ;;  %v948_v62 = vadd.f32 %v946_v2, %v864_v37  ;;  %v651_v27 = vadd.f32 %v647_v30, %v1842_v33  ;;  %v662_v14 = vsel %vm239_vm1, %v656_v0, %v654_v54 }
 0x112   :  { %v2238_v5 = vmul.f32 %v2537_v48, %v1905_v11  ;;  %v888_v19 = vadd.f32 %v886_v13, %v804_v20  ;;  %v975_v12 = vmul.f32 %v974_v15, %v1984_v40  ;;  %v980_v22 = vmul.f32 %v979_v36, %v2002_v46  ;;  %s1090_s11 = sshll.u32 %s2547_s10, 4  ;;  %s1091_s11 = int_to_ptr.hbm [resolvable:$true] %s1090_s11 }
 0x113   :  { %v875_v31 = vstv %s2195_s19  ;;  %v953_v4 = vadd.f32 %v951_v6, %v948_v62  ;;  %v666_v1 = vadd.f32 %v662_v14, %v651_v27  ;;  %v793_v43 = vmul.f32 %v791_v29, %v1950_v3 }
 0x114   :  { %v880_v2 = vstv %s2206_s0  ;;  %v893_v8 = vadd.f32 %v891_v61, %v888_v19  ;;  %v964_v33 = vstv %s2212_s1  ;;  %v638_v51 = vmul.f32 %v637_v53, %v2525_v7 }
 0x115   :  { %v640_v13 = vmul.f32 %v637_v53, %v2526_v55  ;;  %1024 = vrot.lane.b32.xlu0 %v953_v4, %s1292_s8  ;;  %v790_v56 = vadd.f32 %v1925_v52, %v666_v1  ;;  %v877_v6 = vmul.f32 %v875_v31, %v1965_v28  ;;  %v653_v41 = vmul.f32 %v652_v63, %v2527_v18 }
 0x116   :  { %v655_v59 = vmul.f32 %v652_v63, %v2528_v10  ;;  %v977_v57 = vadd.f32 %v975_v12, %v893_v8  ;;  %v882_v9 = vmul.f32 %v880_v2, %v1978_v44  ;;  %v969_v53 = vstv %s2218_s20 }
 0x117   :  { %v646_v37 = vsel %vm239_vm1, %v640_v13, %v638_v51  ;;  %v795_v54 = vadd.f32 %v793_v43, %v790_v56  ;;  %v966_v52 = vmul.f32 %v964_v33, %v1993_v34  ;;  %v792_v63 = vmul.f32 %v791_v29, %v1905_v11 }
 0x118   :  { %v650_v0 = vadd.f32 %v646_v37, %v1840_v23  ;;  %v661_v20 = vsel %vm239_vm1, %v655_v59, %v653_v41  ;;  %v982_v61 = vadd.f32 %v980_v22, %v977_v57  ;;  %v697_v30 = vstv %s2225_s21 }
 0x119   :  { %v712_v48 = vstv %s2233_s22  ;;  %v879_v62 = vadd.f32 %v877_v6, %v795_v54  ;;  %v699_v14 = vmul.f32 %v697_v30, %v2522_v45  ;;  %v701_v19 = vmul.f32 %v697_v30, %v1336_v60 }
 0x11a   :  { %v665_v27 = vadd.f32 %v661_v20, %v650_v0  ;;  %1050 = vrot.lane.b32.xlu2 %v982_v61, %s1294_s27  ;;  %v971_v12 = vmul.f32 %v969_v53, %v2006_v24  ;;  %v714_v23 = vmul.f32 %v712_v48, %v2523_v35  ;;  %v716_v29 = vmul.f32 %v712_v48, %v2524_v26 }
 0x11b   :  { %v811_v22 = vstv %s2249_s23  ;;  %v884_v4 = vadd.f32 %v882_v9, %v879_v62  ;;  %v876_v43 = vmul.f32 %v875_v31, %v1956_v50  ;;  %v707_v8 = vsel %vm239_vm1, %v701_v19, %v699_v14 }
 0x11c   :  { %v789_v1 = vadd.f32 %v1923_v38, %v665_v27  ;;  %v881_v51 = vmul.f32 %v880_v2, %v1974_v16  ;;  %v965_v13 = vmul.f32 %v964_v33, %v1984_v40  ;;  %v711_v56 = vadd.f32 %v707_v8, %v1860_v17 }
 0x11d   :  { %v722_v6 = vsel %vm239_vm1, %v716_v29, %v714_v23  ;;  %v968_v41 = vadd.f32 %v966_v52, %v884_v4  ;;  %v813_v57 = vmul.f32 %v811_v22, %v1950_v3  ;;  %v895_v37 = vstv %s2256_s24 }
 0x11e   :  { %v794_v59 = vadd.f32 %v792_v63, %v789_v1  ;;  %v726_v9 = vadd.f32 %v722_v6, %v711_v56  ;;  %v900_v54 = vstv %s2263_s25  ;;  %v984_v38 = vstv %s2268_s26 }
 0x11f   :  { %v698_v31 = vmul.f32 %v697_v30, %v2525_v7  ;;  %v973_v0 = vadd.f32 %v971_v12, %v968_v41  ;;  %v970_v2 = vmul.f32 %v969_v53, %v2002_v46  ;;  %v700_v33 = vmul.f32 %v697_v30, %v2526_v55 }
 0x120   :  { %v878_v20 = vadd.f32 %v876_v43, %v794_v59  ;;  %v810_v17 = vadd.f32 %v1946_v32, %v726_v9  ;;  %v897_v52 = vmul.f32 %v895_v37, %v1965_v28  ;;  %v713_v61 = vmul.f32 %v712_v48, %v2527_v18 }
 0x121   :  { %v715_v63 = vmul.f32 %v712_v48, %v2528_v10  ;;  %1039 = vrot.lane.b32.xlu1 %v973_v0, %s1295_s30  ;;  %v902_v62 = vmul.f32 %v900_v54, %v1978_v44  ;;  %v986_v27 = vmul.f32 %v984_v38, %v1993_v34  ;;  %v706_v53 = vsel %vm239_vm1, %v700_v33, %v698_v31 }
 0x122   :  { %v883_v7 = vadd.f32 %v881_v51, %v878_v20  ;;  %v815_v55 = vadd.f32 %v813_v57, %v810_v17  ;;  %v989_v30 = vstv %s2280_s28  ;;  %v710_v14 = vadd.f32 %v706_v53, %v1858_v25  ;;  %v2539_v20 = vld [vmem:[#allocation33_spill] sm:$0xff] }
 0x123   :  { %v721_v32 = vsel %vm239_vm1, %v715_v63, %v713_v61  ;;  %v812_v48 = vmul.f32 %v811_v22, %v1905_v11  ;;  %v669_v12 = vmul.f32 %v2165_v58, %v2522_v45  ;;  %v671_v23 = vmul.f32 %v2165_v58, %v1336_v60  ;;  %v2538_v22 = vld [vmem:[#allocation28_spill] sm:$0xff]  ;;  %v2541_v63 = vld [vmem:[#allocation30_spill] sm:$0xff] }
 0x124   :  { %v967_v19 = vadd.f32 %v965_v13, %v883_v7  ;;  %v899_v29 = vadd.f32 %v897_v52, %v815_v55  ;;  %v725_v4 = vadd.f32 %v721_v32, %v710_v14  ;;  %v684_v1 = vmul.f32 %v2168_v49, %v2523_v35  ;;  %v2540_v52 = vld [vmem:[#allocation29_spill] sm:$0xff]  ;;  %v2543_v32 = vld [vmem:[#allocation32_spill] sm:$0xff] }
 0x125   :  { %v686_v25 = vmul.f32 %v2168_v49, %v2524_v26  ;;  %v991_v8 = vmul.f32 %v989_v30, %v2006_v24  ;;  %v896_v11 = vmul.f32 %v895_v37, %v1956_v50  ;;  %v677_v45 = vsel %vm239_vm1, %v671_v23, %v669_v12 }
 0x126   :  { %v972_v43 = vadd.f32 %v970_v2, %v967_v19  ;;  %v904_v60 = vadd.f32 %v902_v62, %v899_v29  ;;  %v809_v58 = vadd.f32 %v1937_v21, %v725_v4  ;;  %v681_v51 = vadd.f32 %v677_v45, %v2538_v22 }
 0x127   :  { %v692_v13 = vsel %vm239_vm1, %v686_v25, %v684_v1  ;;  %v901_v49 = vmul.f32 %v900_v54, %v1974_v16  ;;  %v985_v56 = vmul.f32 %v984_v38, %v1984_v40  ;;  %v803_v6 = vmul.f32 %v801_v39, %v1950_v3 }
 0x128   :  { %1037 = vrot.lane.b32.xlu0 %v972_v43, %s1295_s30  ;;  %v622_v41 = vstv %s2299_s29  ;;  %v988_v59 = vadd.f32 %v986_v27, %v904_v60  ;;  %v814_v57 = vadd.f32 %v812_v48, %v809_v58  ;;  %v696_v21 = vadd.f32 %v692_v13, %v681_v51 }
 0x129   :  { %v623_v37 = vmul.f32 %v622_v41, %v2527_v18  ;;  %v887_v9 = vmul.f32 %v885_v47, %v1965_v28  ;;  %v624_v54 = vmul.f32 %v622_v41, %v2523_v35  ;;  %v625_v38 = vmul.f32 %v622_v41, %v2528_v10 }
 0x12a   :  { %v626_v39 = vmul.f32 %v622_v41, %v2524_v26  ;;  %v993_v31 = vadd.f32 %v991_v8, %v988_v59  ;;  %v898_v0 = vadd.f32 %v896_v11, %v814_v57  ;;  %v800_v2 = vadd.f32 %v2539_v20, %v696_v21 }
 0x12b   :  { %v865_v33 = vstv %s2311_s3  ;;  %v990_v18 = vmul.f32 %v989_v30, %v2002_v46  ;;  %v892_v47 = vmul.f32 %v890_v42, %v1978_v44  ;;  %v631_v17 = vsel %vm239_vm1, %v625_v38, %v623_v37  ;;  %v2542_v30 = vld [vmem:[#allocation31_spill] sm:$0xff] }
 0x12c   :  { %v632_v35 = vsel %vm239_vm1, %v626_v39, %v624_v54  ;;  %1065 = vrot.lane.b32.xlu2 %v993_v31, %s1296_s7  ;;  %v903_v26 = vadd.f32 %v901_v49, %v898_v0  ;;  %v805_v10 = vadd.f32 %v803_v6, %v800_v2  ;;  %v635_v61 = vadd.f32 %v631_v17, %v2540_v52  ;;  %v2545_v54 = vld [vmem:[#allocation21_spill] sm:$0xff]  ;;  %v2546_v39 = vld [vmem:[#allocation24_spill] sm:$0xff] }
 0x12d   :  { %v636_v7 = vadd.f32 %v632_v35, %v2541_v63  ;;  %v976_v62 = vmul.f32 %v974_v15, %v1993_v34  ;;  %v866_v42 = vmul.f32 %v865_v33, %v1956_v50  ;;  %v870_v27 = vstv %s2325_s4 }
 0x12e   :  { %v987_v53 = vadd.f32 %v985_v56, %v903_v26  ;;  %v889_v55 = vadd.f32 %v887_v9, %v805_v10  ;;  %v779_v14 = vadd.f32 %v2542_v30, %v635_v61  ;;  %v981_v48 = vmul.f32 %v979_v36, %v2006_v24 }
 0x12f   :  { %v780_v19 = vadd.f32 %v2543_v32, %v636_v7  ;;  %v954_v12 = vstv %s2335_s5  ;;  %v871_v15 = vmul.f32 %v870_v27, %v1974_v16  ;;  %v959_v1 = vstv %s2342_s6 }
 0x130   :  { %v992_v23 = vadd.f32 %v990_v18, %v987_v53  ;;  %v894_v29 = vadd.f32 %v892_v47, %v889_v55  ;;  %v784_v4 = vadd.f32 %v2238_v5, %v779_v14  ;;  %v955_v43 = vmul.f32 %v954_v12, %v1984_v40 }
 0x131   :  { %v960_v45 = vmul.f32 %v959_v1, %v2002_v46  ;;  %v2544_v16 = vstv %s1828_s14  ;;  %v867_v56 = vmul.f32 %v865_v33, %v1965_v28  ;;  %v872_v6 = vmul.f32 %v870_v27, %v1978_v44  ;;  %s1297_s14 = smov [#allocation9]  }
 0x132   :  { %1063 = vrot.lane.b32.xlu1 %v992_v23, %s1296_s7  ;;  %v978_v50 = vadd.f32 %v976_v62, %v894_v29  ;;  %v868_v25 = vadd.f32 %v866_v42, %v784_v4  ;;  %v783_v51 = vmul.f32 %v2544_v16, %v1950_v3  ;;  %v956_v57 = vmul.f32 %v954_v12, %v1993_v34  ;;  %s1088_s2 = sshll.u32 %s1297_s14, 4  ;;  %s1089_s2 = int_to_ptr.vmem [resolvable:$true] %s1088_s2 }
 0x133   :  { %v961_v37 = vmul.f32 %v959_v1, %v2006_v24  ;;  %v133_v38 = vshra.s32 %v2545_v54, 4  ;;  %v134_v3 = vshra.s32 %v2546_v39, 4  ;;  %vm1026_vm1 = vcmp.lt.s32.totalorder %v2545_v54, 16 }
 0x134   :  { %v983_v8 = vadd.f32 %v981_v48, %v978_v50  ;;  %v873_v11 = vadd.f32 %v871_v15, %v868_v25  ;;  %v785_v40 = vadd.f32 %v783_v51, %v780_v19  ;;  %vm1000_vm5 = vcmp.lt.s32.totalorder %v2545_v54, 48 }
 0x135   :  { %vm1013_vm6 = vcmp.lt.s32.totalorder %v2545_v54, 32  ;;  %vm1041_vm7 = vcmp.lt.s32.totalorder %v2545_v54, 112  ;;  %vm994_vm8 = vcmp.ge.s32.totalorder %v133_v38, 3  ;;  %vm995_vm9 = vcmp.ge.s32.totalorder %v134_v3, 3 }
 0x136   :  { %1052 = vrot.lane.b32.xlu0 %v983_v8, %s1294_s27  ;;  %v957_v36 = vadd.f32 %v955_v43, %v873_v11  ;;  %v869_v46 = vadd.f32 %v867_v56, %v785_v40  ;;  %vm1021_vm10 = vcmp.ge.s32.totalorder %v134_v3, 1  ;;  %vm1007_vm11 = vcmp.ge.s32.totalorder %v133_v38, 2 }
 0x137   :  { %vm1008_vm12 = vcmp.ge.s32.totalorder %v134_v3, 2  ;;  %vm1020_vm13 = vcmp.ge.s32.totalorder %v133_v38, 1  ;;  %vm1036_vm14 = vcmp.lt.s32.totalorder %v134_v3, 15  ;;  %vm1035_vm15 = vcmp.lt.s32.totalorder %v133_v38, 15 }
 0x138   :  { %v2374_v60 = vadd.f32 %v960_v45, %v957_v36  ;;  %v874_v59 = vadd.f32 %v872_v6, %v869_v46  ;;  %vm1067_vm0 = vcmp.lt.s32.totalorder %v2545_v54, 80  ;;  %vm1062_vm2 = vcmp.lt.s32.totalorder %v134_v3, 13 }
 0x139   :  { %vm1061_vm3 = vcmp.lt.s32.totalorder %v133_v38, 13  ;;  %vm1054_vm4 = vcmp.lt.s32.totalorder %v2545_v54, 96 }
 0x13a   :  { %v958_v31 = vadd.f32 %v956_v57, %v874_v59 }
 0x13c   :  { %v963_v28 = vadd.f32 %v961_v37, %v958_v31 }
 0x158   :  { %v1023_v58 = vpop.permute.xlu2 %1022 }
 0x163   :  { %v1012_v13 = vpop.permute.xlu2 %1011 }
 0x16b   :  { %v999_v5 = vpop.permute.xlu1 %998 }
 0x174   :  { %v1051_v21 = vpop.permute.xlu2 %1050 }
 0x176   :  { %v997_v22 = vpop.permute.xlu0 %996 }
 0x177   :  { %v1001_v24 = vsel %vm1000_vm5, %v997_v22, %v999_v5  ;;  %v1002_v47 = vsel %vm1000_vm5, %v999_v5, %v997_v22  ;;  %vm1049_vm5 = vcmp.lt.s32.totalorder %v134_v3, 14 }
 0x178   :  { %v1004_v17 = vsel %vm995_vm9, %v1001_v24, 0.0  ;;  %v1003_v53 = vsel %vm994_vm8, %v1002_v47, 0.0 }
 0x182   :  { %v1010_v49 = vpop.permute.xlu1 %1009 }
 0x183   :  { %v1015_v0 = vsel %vm1013_vm6, %v1012_v13, %v1010_v49  ;;  %v1014_v33 = vsel %vm1013_vm6, %v1010_v49, %v1012_v13  ;;  %vm1079_vm6 = vcmask 1041408  }
 0x184   :  { %v1016_v10 = vsel %vm1007_vm11, %v1015_v0, 0.0  ;;  %v1017_v7 = vsel %vm1008_vm12, %v1014_v33, 0.0 }
 0x185   :  { %v1033_v19 = vadd.f32 %v1016_v10, %v2374_v60  ;;  %v1034_v48 = vadd.f32 %v1017_v7, %v963_v28 }
 0x186   :  { %v1066_v26 = vpop.permute.xlu2 %1065 }
 0x187   :  { %v1025_v41 = vpop.permute.xlu0 %1024 }
 0x188   :  { %v1027_v34 = vsel %vm1026_vm1, %v1023_v58, %v1025_v41  ;;  %v1028_v20 = vsel %vm1026_vm1, %v1025_v41, %v1023_v58  ;;  %vm1048_vm1 = vcmp.lt.s32.totalorder %v133_v38, 14 }
 0x189   :  { %v1030_v18 = vsel %vm1021_vm10, %v1027_v34, 0.0  ;;  %v1029_v52 = vsel %vm1020_vm13, %v1028_v20, 0.0 }
 0x18a   :  { %v1032_v62 = vadd.f32 %v1030_v18, %v1004_v17  ;;  %v1031_v14 = vadd.f32 %v1029_v52, %v1003_v53 }
 0x193   :  { %v1040_v9 = vpop.permute.xlu1 %1039 }
 0x19a   :  { %v1038_v44 = vpop.permute.xlu0 %1037 }
 0x19b   :  { %v1043_v2 = vsel %vm1041_vm7, %v1040_v9, %v1038_v44  ;;  %v1042_v35 = vsel %vm1041_vm7, %v1038_v44, %v1040_v9 }
 0x19c   :  { %v1045_v61 = vsel %vm1036_vm14, %v1043_v2, 0.0  ;;  %v1044_v55 = vsel %vm1035_vm15, %v1042_v35, 0.0 }
 0x19d   :  { %v1047_v32 = vadd.f32 %v1045_v61, %v1032_v62  ;;  %v1046_v29 = vadd.f32 %v1044_v55, %v1031_v14 }
 0x1a4   :  { %v1064_v63 = vpop.permute.xlu1 %1063 }
 0x1a5   :  { %v1068_v42 = vsel %vm1067_vm0, %v1064_v63, %v1066_v26  ;;  %v1069_v27 = vsel %vm1067_vm0, %v1066_v26, %v1064_v63 }
 0x1a6   :  { %v1071_v30 = vsel %vm1062_vm2, %v1069_v27, 0.0  ;;  %v1070_v12 = vsel %vm1061_vm3, %v1068_v42, 0.0 }
 0x1a7   :  { %v1073_v4 = vadd.f32 %v1071_v30, %v1047_v32  ;;  %v1072_v43 = vadd.f32 %v1070_v12, %v1046_v29 }
 0x1a8   :  { %v1053_v23 = vpop.permute.xlu0 %1052 }
 0x1a9   :  { %v1055_v15 = vsel %vm1054_vm4, %v1051_v21, %v1053_v23  ;;  %v1056_v1 = vsel %vm1054_vm4, %v1053_v23, %v1051_v21 }
 0x1aa   :  { %v1057_v50 = vsel %vm1048_vm1, %v1055_v15, 0.0  ;;  %v1058_v25 = vsel %vm1049_vm5, %v1056_v1, 0.0 }
 0x1ab   :  { %v1059_v8 = vadd.f32 %v1057_v50, %v1033_v19  ;;  %v1060_v11 = vadd.f32 %v1058_v25, %v1034_v48 }
 0x1ad   :  { %v1075_v45 = vadd.f32 %v1073_v4, %v1060_v11  ;;  %v1074_v36 = vadd.f32 %v1072_v43, %v1059_v8 }
 0x1af   :  { %v1078_v60 = vrot.slane %v1075_v45, 6 }
 0x1b1   :  { %v1080_v58 = vsel %vm1079_vm6, %v1074_v36, %v1078_v60 }
 0x1b2   :  { %1082 = vst [vmem:[#allocation9] sm:$0xf] %v1080_v58 }
 0x1b3   :  { %1093 = dma.vmem_to_hbm [thread:$0]  %s1089_s2, 64, %s1091_s11, [#allocation6]  }
 0x1b4   :  { %1279 = dma.done.wait [#allocation6], 64  }
 0x1b5   :  { %1280 = vsyncadd [#allocation6], 4294967232 }
 0x1b6   :  { %1098 = vsyncpa [#allocation5], 1 }
 0x1b7   :  { %1099 = vsyncpa [#allocation6], 1 }
 0x1b8   :  { %1100 = vsyncpa [#allocation7], 1 }

</bundles_post_ra>
